<compile_context>
chip_gen: v6e
topology: v6e:2x2x1
jax: 0.10.0
libtpu: 0.0.40
codegen_flags: <defaults>
</compile_context>

<pallas_src>
import functools

import numpy as np
import jax
import jax.numpy as jnp
from jax.experimental import pallas as pl
from jax.experimental.pallas import tpu as pltpu

WIN_SIZE = 11
WIN_SIGMA = 1.5
DATA_RANGE = 255.0
K1, K2 = 0.01, 0.03


def _gaussian_window(size: int, sigma: float) -> np.ndarray:
    # Mirrors pytorch_msssim._fspecial_gauss_1d
    coords = np.arange(size, dtype=np.float64) - size // 2
    g = np.exp(-(coords ** 2) / (2.0 * sigma ** 2))
    g /= g.sum()
    return g.astype(np.float32)


_WIN = _gaussian_window(WIN_SIZE, WIN_SIGMA)


def _band_matrix_w(W: int) -> jnp.ndarray:
    """Banded matrix implementing the 'valid' Gaussian filter along W."""
    Wo = W - WIN_SIZE + 1
    gw = np.zeros((W, Wo), np.float32)
    for j in range(Wo):
        gw[j:j + WIN_SIZE, j] = _WIN
    return jnp.asarray(gw)


def _ssim_tile_kernel(x_ref, y_ref, gw_ref, out_ref, *, n_total, needs_mask):
    x = x_ref[...].astype(jnp.float32)   # (TN, H, W)
    y = y_ref[...].astype(jnp.float32)
    gw = gw_ref[...]                     # (W, Wo)

    tn, h, w = x.shape
    wo = gw.shape[1]
    ho = h - WIN_SIZE + 1

    if needs_mask:
        # Tail tile: rows >= valid are out-of-bounds garbage; zero them before
        # any arithmetic so nothing downstream can turn into inf/nan.
        valid = jnp.minimum(tn, n_total - pl.program_id(0) * tn)
        row_w = jax.lax.broadcasted_iota(jnp.int32, (tn, w), 0)
        live_in = (row_w < valid)[:, None, :]        # (TN, 1, W)
        x = jnp.where(live_in, x, 0.0)
        y = jnp.where(live_in, y, 0.0)

    # Stack the four filter inputs along the batch axis:
    #   [x, y, x*y, x*x + y*y]  ->  one Gaussian pass instead of 4-5.
    s = jnp.concatenate([x, y, x * y, x * x + y * y], axis=0)   # (4*TN, H, W)

    # W direction: single big 2D MXU matmul (one gw weight push per tile).
    t = jnp.dot(s.reshape(4 * tn * h, w), gw,
                preferred_element_type=jnp.float32).reshape(4 * tn, h, wo)

    # H direction: 11-tap shift-accumulate ("valid" conv) on the VPU/XLU.
    f = float(_WIN[0]) * t[:, 0:ho, :]
    for k in range(1, WIN_SIZE):
        f = f + float(_WIN[k]) * t[:, k:k + ho, :]              # (4*TN, Ho, Wo)

    mu1 = f[0 * tn:1 * tn]
    mu2 = f[1 * tn:2 * tn]
    e_xy = f[2 * tn:3 * tn]
    e_sq = f[3 * tn:4 * tn]

    c1 = (K1 * DATA_RANGE) ** 2
    c2 = (K2 * DATA_RANGE) ** 2

    mu1_mu2 = mu1 * mu2
    mu_sq = mu1 * mu1 + mu2 * mu2
    sigma12 = e_xy - mu1_mu2
    sigma_sq = e_sq - mu_sq                          # sigma1^2 + sigma2^2

    num = (2.0 * mu1_mu2 + c1) * (2.0 * sigma12 + c2)
    den = (mu_sq + c1) * (sigma_sq + c2)
    ssim_map = num / den                             # (TN, Ho, Wo)

    if needs_mask:
        row_o = jax.lax.broadcasted_iota(jnp.int32, (tn, wo), 0)
        live_out = (row_o < valid)[:, None, :]       # (TN, 1, Wo)
        tile_sum = jnp.sum(jnp.where(live_out, ssim_map, 0.0))
    else:
        tile_sum = jnp.sum(ssim_map)

    # Lane-dense, (8,128)-aligned per-tile output slab; wrapper reads [i,0,0].
    out_ref[...] = jnp.full(out_ref.shape, tile_sum, dtype=jnp.float32)


def _vmem_capacity_bytes() -> int:
    try:
        info = pltpu.get_tpu_info()
        cap = int(getattr(info, "vmem_capacity_bytes", 0))
        if cap > 0:
            return cap
    except Exception:
        pass
    return 64 * 1024 * 1024   # conservative default (v7x per-core VMEM)


def _vmem_plan(N, H, W, in_itemsize, cap):
    """Per-tile VMEM accounting -> (max tile_n, per_row_bytes, fixed_bytes)."""
    Ho, Wo = H - WIN_SIZE + 1, W - WIN_SIZE + 1
    per_row = (
        2 * 2 * H * W * in_itemsize     # x, y double-buffered input DMA slabs
        + 6 * H * W * 4                 # f32 casts + 4-map stacked filter input
        + 4 * H * Wo * 4                # W-filtered stack
        + 12 * Ho * Wo * 4              # H-filtered maps + epilogue temps
    )
    fixed = 2 * W * Wo * 4 + 256 * 1024  # (double-buffered) gw + misc slack
    budget = int(cap * 0.60)             # headroom for compiler scratch/spills
    tn = max(1, (budget - fixed) // per_row)
    return int(min(tn, N)), per_row, fixed


def ssim_loss(img1: jax.Array, img2: jax.Array, *, tile_n: int | None = None) -> jax.Array:
    """1 - SSIM(img1, img2); img1/img2 are NCHW, H and W must be >= 11."""
    B, C, H, W = img1.shape
    assert img2.shape == img1.shape
    assert H >= WIN_SIZE and W >= WIN_SIZE

    N = B * C
    Ho, Wo = H - WIN_SIZE + 1, W - WIN_SIZE + 1

    # Keep the source dtype for the DMA; cast to f32 inside the kernel.
    x = img1.reshape(N, H, W)
    y = img2.reshape(N, H, W)

    cap = _vmem_capacity_bytes()
    auto_tn, per_row, fixed = _vmem_plan(N, H, W, jnp.dtype(x.dtype).itemsize, cap)
    if tile_n is None:
        tile_n = auto_tn
        if N >= 2:
            # Keep >= 2 grid tiles so both v7x TensorCores get work on the
            # "parallel" N axis (one extra ~0.35us grid step elsewhere).
            tile_n = min(tile_n, -(-N // 2))
    tile_n = max(1, min(int(tile_n), N))

    # Redistribute so the ragged tail (if any) is minimal, then re-derive the
    # grid so the last block always starts in bounds.
    num_tiles = -(-N // tile_n)
    tile_n = -(-N // num_tiles)
    num_tiles = -(-N // tile_n)
    needs_mask = (num_tiles * tile_n != N)   # handled in-kernel; no jnp.pad copy

    gw = _band_matrix_w(W)

    vmem_need = fixed + per_row * tile_n + (4 << 20)
    vmem_limit = int(min(cap * 0.9, max(cap * 0.8, float(vmem_need))))

    kernel = functools.partial(_ssim_tile_kernel, n_total=N, needs_mask=needs_mask)

    partials = pl.pallas_call(
        kernel,
        out_shape=jax.ShapeDtypeStruct((num_tiles, 8, 128), jnp.float32),
        grid=(num_tiles,),
        in_specs=[
            pl.BlockSpec((tile_n, H, W), lambda i: (i, 0, 0)),
            pl.BlockSpec((tile_n, H, W), lambda i: (i, 0, 0)),
            pl.BlockSpec((W, Wo), lambda i: (0, 0)),   # resident across the grid
        ],
        out_specs=pl.BlockSpec((1, 8, 128), lambda i: (i, 0, 0)),
        compiler_params=pltpu.CompilerParams(
            dimension_semantics=("parallel",),
            vmem_limit_bytes=vmem_limit,
        ),
    )(x, y, gw)

    total = jnp.sum(partials[:, 0, 0])
    ssim_val = total / jnp.float32(N * Ho * Wo)
    return (1.0 - ssim_val).astype(jnp.float32)


if __name__ == "__main__":
    key = jax.random.PRNGKey(0)
    k1, k2 = jax.random.split(key)
    # Small NCHW inputs; values in [0, 255] to match data_range=255 default.
    img1 = jax.random.uniform(k1, (2, 4, 16, 16), jnp.float32) * 255.0
    img2 = jax.random.uniform(k2, (2, 4, 16, 16), jnp.float32) * 255.0

    loss = jax.block_until_ready(ssim_loss(img1, img2))
    assert loss.shape == () and bool(jnp.isfinite(loss))

    # Also exercise the multi-tile + ragged-tail (in-kernel masking) path.
    loss_tiled = jax.block_until_ready(ssim_loss(img1, img2, tile_n=3))
    assert bool(jnp.isfinite(loss_tiled))
    assert abs(float(loss) - float(loss_tiled)) < 1e-3

    print("KERNEL_OK")
</pallas_src>

<mosaic_0001>
module attributes {stable_mosaic.version = 11 : i64} {
  func.func @_ssim_tile_kernel(%arg0: i32, %arg1: memref<4x16x16xf32, #tpu.memory_space<vmem>>, %arg2: memref<4x16x16xf32, #tpu.memory_space<vmem>>, %arg3: memref<16x6xf32, #tpu.memory_space<vmem>>, %arg4: memref<1x8x128xf32, #tpu.memory_space<vmem>>) attributes {dimension_semantics = [#tpu.dimension_semantics<parallel>], iteration_bounds = array<i64: 2>, scalar_prefetch = 0 : i64, scratch_operands = 0 : i64, tpu.core_type = #tpu.core_type<tc>, window_params = [{transform_indices = @transform_0, window_bounds = array<i64: 4, 16, 16>}, {transform_indices = @transform_1, window_bounds = array<i64: 4, 16, 16>}, {pipeline_mode = #tpu.pipeline_mode<synchronous>, transform_indices = @transform_2, window_bounds = array<i64: 16, 6>}, {transform_indices = @transform_3, window_bounds = array<i64: 1, 8, 128>}]} {
    %c0 = arith.constant 0 : index
    %c0_0 = arith.constant 0 : index
    %c0_1 = arith.constant 0 : index
    %0 = vector.load %arg1[%c0, %c0_0, %c0_1] : memref<4x16x16xf32, #tpu.memory_space<vmem>>, vector<4x16x16xf32>
    %c0_2 = arith.constant 0 : index
    %c0_3 = arith.constant 0 : index
    %c0_4 = arith.constant 0 : index
    %1 = vector.load %arg2[%c0_2, %c0_3, %c0_4] : memref<4x16x16xf32, #tpu.memory_space<vmem>>, vector<4x16x16xf32>
    %c0_5 = arith.constant 0 : index
    %c0_6 = arith.constant 0 : index
    %2 = vector.load %arg3[%c0_5, %c0_6] : memref<16x6xf32, #tpu.memory_space<vmem>>, vector<16x6xf32>
    %3 = arith.mulf %0, %1 : vector<4x16x16xf32>
    %4 = arith.mulf %0, %0 : vector<4x16x16xf32>
    %5 = arith.mulf %1, %1 : vector<4x16x16xf32>
    %6 = arith.addf %4, %5 : vector<4x16x16xf32>
    %7 = tpu.concatenate %0, %1, %3, %6 in 0 : vector<4x16x16xf32>, vector<4x16x16xf32>, vector<4x16x16xf32>, vector<4x16x16xf32> -> vector<16x16x16xf32>
    %8 = vector.shape_cast %7 : vector<16x16x16xf32> to vector<256x16xf32>
    %cst = arith.constant dense<0.000000e+00> : vector<256x6xf32>
    %9 = tpu.matmul %8, %2, %cst {dimension_numbers = #tpu.dot_dimension_numbers<[1], [0], [0], [1], [0, 0, 1, 1], [], []>} : vector<256x16xf32>, vector<16x6xf32>, vector<256x6xf32> -> vector<256x6xf32>
    %10 = vector.shape_cast %9 : vector<256x6xf32> to vector<16x16x6xf32>
    %11 = vector.extract_strided_slice %10 {offsets = [0, 0, 0], sizes = [16, 6, 6], strides = [1, 1, 1]} : vector<16x16x6xf32> to vector<16x6x6xf32>
    %cst_7 = arith.constant 0.00102838012 : f32
    %12 = vector.broadcast %cst_7 : f32 to vector<16x6x6xf32>
    %13 = arith.mulf %12, %11 : vector<16x6x6xf32>
    %14 = vector.extract_strided_slice %10 {offsets = [0, 1, 0], sizes = [16, 6, 6], strides = [1, 1, 1]} : vector<16x16x6xf32> to vector<16x6x6xf32>
    %cst_8 = arith.constant 0.00759875821 : f32
    %15 = vector.broadcast %cst_8 : f32 to vector<16x6x6xf32>
    %16 = arith.mulf %15, %14 : vector<16x6x6xf32>
    %17 = arith.addf %13, %16 : vector<16x6x6xf32>
    %18 = vector.extract_strided_slice %10 {offsets = [0, 2, 0], sizes = [16, 6, 6], strides = [1, 1, 1]} : vector<16x16x6xf32> to vector<16x6x6xf32>
    %cst_9 = arith.constant 0.0360007733 : f32
    %19 = vector.broadcast %cst_9 : f32 to vector<16x6x6xf32>
    %20 = arith.mulf %19, %18 : vector<16x6x6xf32>
    %21 = arith.addf %17, %20 : vector<16x6x6xf32>
    %22 = vector.extract_strided_slice %10 {offsets = [0, 3, 0], sizes = [16, 6, 6], strides = [1, 1, 1]} : vector<16x16x6xf32> to vector<16x6x6xf32>
    %cst_10 = arith.constant 0.109360687 : f32
    %23 = vector.broadcast %cst_10 : f32 to vector<16x6x6xf32>
    %24 = arith.mulf %23, %22 : vector<16x6x6xf32>
    %25 = arith.addf %21, %24 : vector<16x6x6xf32>
    %26 = vector.extract_strided_slice %10 {offsets = [0, 4, 0], sizes = [16, 6, 6], strides = [1, 1, 1]} : vector<16x16x6xf32> to vector<16x6x6xf32>
    %cst_11 = arith.constant 0.213005543 : f32
    %27 = vector.broadcast %cst_11 : f32 to vector<16x6x6xf32>
    %28 = arith.mulf %27, %26 : vector<16x6x6xf32>
    %29 = arith.addf %25, %28 : vector<16x6x6xf32>
    %30 = vector.extract_strided_slice %10 {offsets = [0, 5, 0], sizes = [16, 6, 6], strides = [1, 1, 1]} : vector<16x16x6xf32> to vector<16x6x6xf32>
    %cst_12 = arith.constant 0.266011715 : f32
    %31 = vector.broadcast %cst_12 : f32 to vector<16x6x6xf32>
    %32 = arith.mulf %31, %30 : vector<16x6x6xf32>
    %33 = arith.addf %29, %32 : vector<16x6x6xf32>
    %34 = vector.extract_strided_slice %10 {offsets = [0, 6, 0], sizes = [16, 6, 6], strides = [1, 1, 1]} : vector<16x16x6xf32> to vector<16x6x6xf32>
    %cst_13 = arith.constant 0.213005543 : f32
    %35 = vector.broadcast %cst_13 : f32 to vector<16x6x6xf32>
    %36 = arith.mulf %35, %34 : vector<16x6x6xf32>
    %37 = arith.addf %33, %36 : vector<16x6x6xf32>
    %38 = vector.extract_strided_slice %10 {offsets = [0, 7, 0], sizes = [16, 6, 6], strides = [1, 1, 1]} : vector<16x16x6xf32> to vector<16x6x6xf32>
    %cst_14 = arith.constant 0.109360687 : f32
    %39 = vector.broadcast %cst_14 : f32 to vector<16x6x6xf32>
    %40 = arith.mulf %39, %38 : vector<16x6x6xf32>
    %41 = arith.addf %37, %40 : vector<16x6x6xf32>
    %42 = vector.extract_strided_slice %10 {offsets = [0, 8, 0], sizes = [16, 6, 6], strides = [1, 1, 1]} : vector<16x16x6xf32> to vector<16x6x6xf32>
    %cst_15 = arith.constant 0.0360007733 : f32
    %43 = vector.broadcast %cst_15 : f32 to vector<16x6x6xf32>
    %44 = arith.mulf %43, %42 : vector<16x6x6xf32>
    %45 = arith.addf %41, %44 : vector<16x6x6xf32>
    %46 = vector.extract_strided_slice %10 {offsets = [0, 9, 0], sizes = [16, 6, 6], strides = [1, 1, 1]} : vector<16x16x6xf32> to vector<16x6x6xf32>
    %cst_16 = arith.constant 0.00759875821 : f32
    %47 = vector.broadcast %cst_16 : f32 to vector<16x6x6xf32>
    %48 = arith.mulf %47, %46 : vector<16x6x6xf32>
    %49 = arith.addf %45, %48 : vector<16x6x6xf32>
    %50 = vector.extract_strided_slice %10 {offsets = [0, 10, 0], sizes = [16, 6, 6], strides = [1, 1, 1]} : vector<16x16x6xf32> to vector<16x6x6xf32>
    %cst_17 = arith.constant 0.00102838012 : f32
    %51 = vector.broadcast %cst_17 : f32 to vector<16x6x6xf32>
    %52 = arith.mulf %51, %50 : vector<16x6x6xf32>
    %53 = arith.addf %49, %52 : vector<16x6x6xf32>
    %54 = vector.extract_strided_slice %53 {offsets = [0, 0, 0], sizes = [4, 6, 6], strides = [1, 1, 1]} : vector<16x6x6xf32> to vector<4x6x6xf32>
    %55 = vector.extract_strided_slice %53 {offsets = [4, 0, 0], sizes = [4, 6, 6], strides = [1, 1, 1]} : vector<16x6x6xf32> to vector<4x6x6xf32>
    %56 = vector.extract_strided_slice %53 {offsets = [8, 0, 0], sizes = [4, 6, 6], strides = [1, 1, 1]} : vector<16x6x6xf32> to vector<4x6x6xf32>
    %57 = vector.extract_strided_slice %53 {offsets = [12, 0, 0], sizes = [4, 6, 6], strides = [1, 1, 1]} : vector<16x6x6xf32> to vector<4x6x6xf32>
    %58 = arith.mulf %54, %55 : vector<4x6x6xf32>
    %59 = arith.mulf %54, %54 : vector<4x6x6xf32>
    %60 = arith.mulf %55, %55 : vector<4x6x6xf32>
    %61 = arith.addf %59, %60 : vector<4x6x6xf32>
    %62 = arith.subf %56, %58 : vector<4x6x6xf32>
    %63 = arith.subf %57, %61 : vector<4x6x6xf32>
    %cst_18 = arith.constant 2.000000e+00 : f32
    %64 = vector.broadcast %cst_18 : f32 to vector<4x6x6xf32>
    %65 = arith.mulf %64, %58 : vector<4x6x6xf32>
    %cst_19 = arith.constant 6.502500e+00 : f32
    %66 = vector.broadcast %cst_19 : f32 to vector<4x6x6xf32>
    %67 = arith.addf %65, %66 : vector<4x6x6xf32>
    %cst_20 = arith.constant 2.000000e+00 : f32
    %68 = vector.broadcast %cst_20 : f32 to vector<4x6x6xf32>
    %69 = arith.mulf %68, %62 : vector<4x6x6xf32>
    %cst_21 = arith.constant 5.852250e+01 : f32
    %70 = vector.broadcast %cst_21 : f32 to vector<4x6x6xf32>
    %71 = arith.addf %69, %70 : vector<4x6x6xf32>
    %72 = arith.mulf %67, %71 : vector<4x6x6xf32>
    %cst_22 = arith.constant 6.502500e+00 : f32
    %73 = vector.broadcast %cst_22 : f32 to vector<4x6x6xf32>
    %74 = arith.addf %61, %73 : vector<4x6x6xf32>
    %cst_23 = arith.constant 5.852250e+01 : f32
    %75 = vector.broadcast %cst_23 : f32 to vector<4x6x6xf32>
    %76 = arith.addf %63, %75 : vector<4x6x6xf32>
    %77 = arith.mulf %74, %76 : vector<4x6x6xf32>
    %78 = arith.divf %72, %77 : vector<4x6x6xf32>
    %79 = vector.shape_cast %78 : vector<4x6x6xf32> to vector<1x4x6x6xf32>
    %cst_24 = arith.constant dense<0.000000e+00> : vector<1xf32>
    %80 = vector.multi_reduction <add>, %79, %cst_24 [1, 2, 3] : vector<1x4x6x6xf32> to vector<1xf32>
    %81 = vector.shape_cast %80 : vector<1xf32> to vector<1x1x1x1xf32>
    %82 = vector.extract %81[0, 0, 0, 0] : f32 from vector<1x1x1x1xf32>
    %83 = vector.broadcast %82 : f32 to vector<1x8x128xf32>
    %c0_25 = arith.constant 0 : index
    %c0_26 = arith.constant 0 : index
    %c0_27 = arith.constant 0 : index
    %84 = vector.load %arg4[%c0_25, %c0_26, %c0_27] : memref<1x8x128xf32, #tpu.memory_space<vmem>>, vector<1x8x128xf32>
    tpu.vector_store %arg4[%c0_25, %c0_26, %c0_27], %83 {strides = array<i32>} : memref<1x8x128xf32, #tpu.memory_space<vmem>>, vector<1x8x128xf32>,
    return
  }
  func.func @transform_0(%arg0: i32) -> (i32, i32, i32) {
    %c0_i32 = arith.constant 0 : i32
    %c0_i32_0 = arith.constant 0 : i32
    %c0_i32_1 = arith.constant 0 : i32
    return %arg0, %c0_i32, %c0_i32_0 : i32, i32, i32
  }
  func.func @transform_1(%arg0: i32) -> (i32, i32, i32) {
    %c0_i32 = arith.constant 0 : i32
    %c0_i32_0 = arith.constant 0 : i32
    %c0_i32_1 = arith.constant 0 : i32
    return %arg0, %c0_i32, %c0_i32_0 : i32, i32, i32
  }
  func.func @transform_2(%arg0: i32) -> (i32, i32) {
    %c0_i32 = arith.constant 0 : i32
    %c0_i32_0 = arith.constant 0 : i32
    %c0_i32_1 = arith.constant 0 : i32
    return %c0_i32, %c0_i32_0 : i32, i32
  }
  func.func @transform_3(%arg0: i32) -> (i32, i32, i32) {
    %c0_i32 = arith.constant 0 : i32
    %c0_i32_0 = arith.constant 0 : i32
    %c0_i32_1 = arith.constant 0 : i32
    return %arg0, %c0_i32, %c0_i32_0 : i32, i32, i32
  }
}

</mosaic_0001>

<bundles_post_ra>
// kernel: tpu_custom_call.1
= control target key start
LH: loop header
LB: loop body
LE: loop exit
PB: predicated region body
PF: predicated region fallthrough
CT: control target
= control target key end

     0   :  { %8 = vsyncpa [#allocation3], 0  ;;  %s2905_s0 = inlined_call_operand.hbm [shape: f32[8,16,16], index: 0, kind: input, shape index: {}]   ;;  %s2906_s1 = inlined_call_operand.hbm [shape: f32[8,16,16], index: 1, kind: input, shape index: {}]   ;;  %s2907_s2 = inlined_call_operand.vmem [shape: f32[16,6], index: 2, kind: input, shape index: {}]   ;;  %s2908_s3 = inlined_call_operand.hbm [shape: f32[2,8,128], index: 3, kind: output, shape index: {}]  }
   0x1   :  { %10 = vsyncpa [#allocation3 + $0x1], 0 }
   0x2   :  { %11 = vsyncpa [#allocation6], 0 }
   0x3   :  { %13 = vsyncpa [#allocation6 + $0x1], 0 }
   0x4   :  { %14 = vsyncpa [#allocation4], 0 }
   0x5   :  { %16 = vsyncpa [#allocation4 + $0x1], 0  ;;  %s2119_s12 = smov 0   ;;  %s2121_s13 = smov 0  }
   0x6   :  { %s2123_s14 = smov 0   ;;  %s2125_s15 = smov 0  }
   0x7 LB: > { %s2140_s16 = sadd.s32 4294967295, %s2092_s15   ;;  %s1760_s17 = sadd.s32 4294967294, %s2092_s15   ;;  %s2092_s15 = sphi %s2125_s15, %s3011_s15   ;;  %s2088_s14 = sphi %s2123_s14, %s3010_s14   ;;  %s2084_s13 = sphi %s2121_s13, %s3009_s13   ;;  %s2080_s12 = sphi %s2119_s12, %s3008_s12  }
   0x8   : > { %s2144_s18 = sadd.s32 1, %s2092_s15   ;;  %s29_s19 = sadd.s32 1, %s2088_s14 }
   0x9   : > { %s26_s20 = ssub.s32 %s2092_s15, %s2144_s18  ;;  %p36_p0 = scmp.ne.s32.totalorder %s2088_s14, %s2084_s13 }
   0xa   : > { %p27_p1 = scmp.eq.s32.totalorder %s26_s20, 0  ;;  %p37_p2 = scmp.eq.s32.totalorder %s2092_s15, 0 }
   0xb   : > { %p42_p3 = scmp.ne.s32.totalorder %s2084_s13, %s2080_s12  ;;  %p43_p4 = scmp.eq.s32.totalorder %s2140_s16, 0 }
   0xc   : > { %s2156_s21 = scalar_select %p27_p1, %s2088_s14, %s29_s19  }
   0xd   : > { %p2158_p5 = por %p37_p2, %p36_p0  ;;  %p2162_p6 = por %p43_p4, %p42_p3 }
   0xe   : > { %p113_p7 = scmp.eq.s32.totalorder %s2140_s16, 1  ;;  %p119_p8 = scmp.eq.s32.totalorder %s1760_s17, 1 }
   0xf   : > { %s2919_s23 = scalar_select %p2162_p6, 1, 0 }
  0x10   : > { %p1924_p10 = scmp.lt.s32.totalorder %s2092_s15, 2  ;;  %p2169_p11 = por %p113_p7, %p36_p0 }
  0x11   : > { %p2173_p12 = por %p119_p8, %p42_p3  ;;  %s2178_s26 = sand.u32 1, %s2088_s14  }
  0x12   : > { %s2920_s24 = scalar_select %p2169_p11, 1, 0 }
  0x13   : > { %s2921_s25 = scalar_select %p2173_p12, 1, 0 }
  0x14   : > { %s1812_s27 = sshll.u32 %s2092_s15, 10  ;;  %s1763_s28 = sshll.u32 %s2178_s26, 6 }
  0x15   : > { %s2187_s4 = scalar_lea.hbm %s2905_s0, %s1812_s27  ;;  %s146_s5 = scalar_lea.vmem [#allocation2], %s1763_s28 }
  0x16   : > { %s154_s6 = sshll.u32 %s146_s5, 4  ;;  %p2193_p13 = pnand %p1924_p10, %p2158_p5  ;;  %s2197_s6 = int_to_ptr.vmem [resolvable:$true] %s154_s6 }
  0x17   : > { %s143_s8 = scalar_lea.sflag [#allocation3], %s2178_s26  ;;  %s1968_s9 = scalar_lea.hbm %s2187_s4, 1024 }
  0x18   : > { %p1969_p0 = scmp.ne.s32.totalorder %s2187_s4, %s1968_s9  ;;  %p1970_p1 = pneg %p2193_p13 }
  0x19   : > { %s1973_s17 = scalar_lea.hbm %s2905_s0, 2048  ;;  %p1974_p4 = scmp.lt.s32.totalorder %s2187_s4, %s2905_s0 }
  0x1a   : > { %p1971_p2 = pnand %p1970_p1, %p1969_p0  ;;  %p1975_p5 = scmp.lt.s32.totalorder %s1973_s17, %s1968_s9 }
  0x1c   : > { %p1972_p3 = pneg %p1971_p2  ;;  %p1976_p7 = por %p1975_p5, %p1974_p4 }
  0x1e   : > { %p1977_p8 = pnand %p1976_p7, %p1972_p3 }
  0x20   : > { %1980 = shalt.err (!%p1977_p8)
}
  0x21   : > { %s1981_s22 = scalar_lea.vmem %s2197_s6, 1024  ;;  %s2094_s29 = smov [#allocation2]  }
  0x22   : > { %p1982_p10 = scmp.ne.s32.totalorder %s2197_s6, %s1981_s22  ;;  %s1986_s30 = sshll.u32 %s2094_s29, 4  ;;  %s1987_s30 = int_to_ptr.vmem [resolvable:$false] %s1986_s30 }
  0x23   : > { %s1988_s5 = scalar_lea.vmem %s1987_s30, 2048  ;;  %p1989_p9 = scmp.lt.s32.totalorder %s2197_s6, %s1987_s30 }
  0x24   : > { %p1984_p0 = pnand %p1982_p10, %p1970_p1  ;;  %p1990_p12 = scmp.lt.s32.totalorder %s1988_s5, %s1981_s22 }
  0x26   : > { %p1985_p2 = pneg %p1984_p0  ;;  %p1991_p11 = por %p1990_p12, %p1989_p9 }
  0x28   : > { %p1992_p4 = pnand %p1991_p11, %p1985_p2 }
  0x2a   : > { %1995 = shalt.err (!%p1992_p4)
}
  0x2b   : > { %s2095_s9 = smov 128   ;;  %s2096_s10 = smov 8  }
  0x2c   : > { %1916 = dma.hbm_to_vmem [thread:$0]  (!%p2193_p13), %s2187_s4, 1024, %s2197_s6, %s143_s8, %s2095_s9, %s2095_s9, %s2096_s10  }
  0x2d   : > { %p1771_p9 = scmp.ge.s32.totalorder %s2092_s15, 1  ;;  %p184_p11 = scmp.lt.s32.totalorder %s2092_s15, 3 }
  0x2e   : > { %s2240_s20 = scalar_lea.hbm %s2906_s1, %s1812_s27  ;;  %s168_s22 = scalar_lea.vmem [#allocation5], %s1763_s28 }
  0x2f   : > { %p2231_p12 = pnand %p1771_p9, %p184_p11  ;;  %s176_s29 = sshll.u32 %s168_s22, 4  ;;  %s2244_s29 = int_to_ptr.vmem [resolvable:$true] %s176_s29 }
  0x30   : > { %s165_s4 = scalar_lea.sflag [#allocation6], %s2178_s26  ;;  %s1996_s6 = scalar_lea.hbm %s2240_s20, 1024 }
  0x31   : > { %p1997_p3 = scmp.ne.s32.totalorder %s2240_s20, %s1996_s6  ;;  %s2001_s27 = scalar_lea.hbm %s2906_s1, 2048 }
  0x32   : > { %p2002_p8 = scmp.lt.s32.totalorder %s2240_s20, %s2906_s1  ;;  %p2003_p10 = scmp.lt.s32.totalorder %s2001_s27, %s1996_s6 }
  0x33   : > { %p1999_p5 = pnand %p1997_p3, %p1970_p1 }
  0x34   : > { %p2004_p0 = por %p2003_p10, %p2002_p8 }
  0x35   : > { %p2000_p7 = pneg %p1999_p5 }
  0x37   : > { %p2005_p2 = pnand %p2004_p0, %p2000_p7 }
  0x39   : > { %2008 = shalt.err (!%p2005_p2)
}
  0x3a   : > { %s2009_s26 = scalar_lea.vmem %s2244_s29, 1024  ;;  %s2097_s28 = smov [#allocation5]  }
  0x3b   : > { %p2010_p4 = scmp.ne.s32.totalorder %s2244_s29, %s2009_s26  ;;  %s2014_s19 = sshll.u32 %s2097_s28, 4  ;;  %s2015_s19 = int_to_ptr.vmem [resolvable:$false] %s2014_s19 }
  0x3c   : > { %s2016_s22 = scalar_lea.vmem %s2015_s19, 2048  ;;  %p2017_p3 = scmp.lt.s32.totalorder %s2244_s29, %s2015_s19 }
  0x3d   : > { %p2012_p9 = pnand %p2010_p4, %p1970_p1  ;;  %p2018_p5 = scmp.lt.s32.totalorder %s2016_s22, %s2009_s26 }
  0x3f   : > { %p2013_p11 = pneg %p2012_p9  ;;  %p2019_p6 = por %p2018_p5, %p2017_p3 }
  0x41   : > { %p2020_p8 = pnand %p2019_p6, %p2013_p11 }
  0x43   : > { %2023 = shalt.err (!%p2020_p8)
}
  0x44   : > { %1919 = dma.hbm_to_vmem [thread:$0]  (!%p2193_p13), %s2240_s20, 1024, %s2244_s29, %s165_s4, %s2095_s9, %s2095_s9, %s2096_s10  }
  0x45   : > { %188 = sbr.rel (%p2231_p12) target bundleno = 689 (0x2b1), region = 32 }
  0x4a   : > { %s2275_s6 = sand.u32 1, %s2084_s13   ;;  %p2924_p6 = scmp.ne.s32.totalorder %s2919_s23, 0 }
  0x4b   : > { %s1772_s8 = sshll.u32 %s2275_s6, 6  ;;  %s191_s30 = scalar_lea.sflag [#allocation3], %s2275_s6 }
  0x4c   : > { %s2279_s27 = scalar_lea.vmem [#allocation2], %s1772_s8 }
  0x4d   : > { %2067 = dma.done.wait (%p2924_p6), %s191_s30, 1024  }
  0x4e   : > { %2069 = vsyncadd (%p2924_p6), %s191_s30, 4294966272  ;;  %s200_s7 = scalar_lea.sflag [#allocation6], %s2275_s6  ;;  %s2286_s9 = scalar_lea.vmem [#allocation5], %s1772_s8 }
  0x4f   : > { %2071 = dma.done.wait (%p2924_p6), %s200_s7, 1024  }
  0x50   : > { %2073 = vsyncadd (%p2924_p6), %s200_s7, 4294966272  ;;  %v250_v0 = vld [vmem:[%s2907_s2 + $0x8] sm:$0xff]  ;;  %v249_v1 = vld [vmem:[%s2907_s2] sm:$0xff]  ;;  %vm283_vm0 = vcmask 130048   ;;  %vm845_vm1 = vcmask 1044480   ;;  %vm990_vm2 = vcmask 1043456  }
  0x51   : > { %v233_v2 = vld [vmem:[%s2279_s27] sm:$0xff]  ;;  %1849 = vmatprep.subr.mxu0 %v250_v0  ;;  %1901 = vmatprep.subr.mxu1 %v250_v0  ;;  %v234_v4 = vld [vmem:[%s2279_s27 + $0x8] sm:$0xff]  ;;  %v235_v8 = vld [vmem:[%s2279_s27 + $0x10] sm:$0xff]  ;;  %vm1135_vm3 = vcmask 1042432   ;;  %vm1216_vm4 = vcmask 1041408   ;;  %vm1297_vm5 = vcmask 1040384  }
  0x52   : > { %v241_v3 = vld [vmem:[%s2286_s9] sm:$0xff]  ;;  %v242_v5 = vld [vmem:[%s2286_s9 + $0x8] sm:$0xff]  ;;  %1850 = vmatpush3.msra.mxu0 %v250_v0  ;;  %1903 = vmatpush3.msra.mxu1 %v250_v0  ;;  %v243_v9 = vld [vmem:[%s2286_s9 + $0x10] sm:$0xff]  ;;  %v259_v22 = vmul.f32 %v233_v2, %v233_v2  ;;  %v260_v27 = vmul.f32 %v234_v4, %v234_v4  ;;  %v261_v30 = vmul.f32 %v235_v8, %v235_v8  ;;  %vm1634_vm6 = vcmask 46080   ;;  %s1774_s23 = sshll.u32 %s2275_s6, 3  ;;  %s1808_s17 = sshll.u32 %s2140_s16, 7 }
  0x53   : > { %v251_v6 = vmul.f32 %v241_v3, %v233_v2  ;;  %v252_v7 = vmul.f32 %v242_v5, %v234_v4  ;;  %1851 = vmatprep.subr.mxu0 %v249_v1  ;;  %1902 = vmatprep.subr.mxu1 %v249_v1  ;;  %v253_v10 = vmul.f32 %v243_v9, %v235_v8  ;;  %v236_v11 = vld [vmem:[%s2279_s27 + $0x18] sm:$0xff]  ;;  %v237_v13 = vld [vmem:[%s2279_s27 + $0x20] sm:$0xff]  ;;  %v238_v17 = vld [vmem:[%s2279_s27 + $0x28] sm:$0xff]  ;;  %s230_s4 = scalar_lea.vmem [#allocation7], %s1774_s23  ;;  %s1665_s22 = scalar_lea.hbm %s2908_s3, %s1808_s17 }
  0x54   : > { %v244_v12 = vld [vmem:[%s2286_s9 + $0x18] sm:$0xff]  ;;  %1852 = vmatpush3.msra.mxu0 %v249_v1  ;;  %1904 = vmatpush3.msra.mxu1 %v249_v1  ;;  %v245_v14 = vld [vmem:[%s2286_s9 + $0x20] sm:$0xff]  ;;  %v246_v18 = vld [vmem:[%s2286_s9 + $0x28] sm:$0xff]  ;;  %v267_v23 = vmul.f32 %v241_v3, %v241_v3  ;;  %v268_v29 = vmul.f32 %v242_v5, %v242_v5  ;;  %v269_v32 = vmul.f32 %v243_v9, %v243_v9  ;;  %s1667_s5 = sshll.u32 %s230_s4, 4  ;;  %s1654_s8 = scalar_lea.sflag [#allocation4], %s2275_s6  ;;  %s2865_s5 = int_to_ptr.vmem [resolvable:$true] %s1667_s5 }
  0x55   : > { %1853 = vmatprep.mubr.msk.f32.mxu0 %vm283_vm0, %v233_v2  ;;  %1877 = vmatprep.mubr.msk.f32.mxu1 %vm283_vm0, %v251_v6  ;;  %v254_v15 = vmul.f32 %v244_v12, %v236_v11  ;;  %v255_v16 = vmul.f32 %v245_v14, %v237_v13  ;;  %v239_v19 = vld [vmem:[%s2279_s27 + $0x30] sm:$0xff]  ;;  %v256_v21 = vmul.f32 %v246_v18, %v238_v17  ;;  %v240_v25 = vld [vmem:[%s2279_s27 + $0x38] sm:$0xff]  ;;  %s2024_s30 = scalar_lea.vmem %s2865_s5, 128  ;;  %p3005_p1 = scmp.ne.s32.totalorder %s2920_s24, 0 }
  0x56   : > { %1854 = vmatmul.mubr.msk.f32.vlgmr.msra.gmra.mxu0 %vm283_vm0, %v234_v4  ;;  %1878 = vmatmul.mubr.msk.f32.vlgmr.msra.gmra.mxu1 %vm283_vm0, %v252_v7  ;;  %v247_v20 = vld [vmem:[%s2286_s9 + $0x30] sm:$0xff]  ;;  %v248_v26 = vld [vmem:[%s2286_s9 + $0x38] sm:$0xff]  ;;  %v275_v31 = vadd.f32 %v267_v23, %v259_v22  ;;  %v262_v33 = vmul.f32 %v236_v11, %v236_v11  ;;  %v276_v34 = vadd.f32 %v268_v29, %v260_v27  ;;  %p2025_p13 = scmp.ne.s32.totalorder %s2865_s5, %s2024_s30  ;;  %s2098_s27 = smov [#allocation7]  }
  0x57   : > { %1856 = vmatprep.mubr.msk.f32.mxu0 %vm283_vm0, %v235_v8  ;;  %1880 = vmatprep.mubr.msk.f32.mxu1 %vm283_vm0, %v253_v10  ;;  %v257_v24 = vmul.f32 %v247_v20, %v239_v19  ;;  %v258_v28 = vmul.f32 %v248_v26, %v240_v25  ;;  %v270_v35 = vmul.f32 %v244_v12, %v244_v12  ;;  %s2028_s16 = sshll.u32 %s2098_s27, 4  ;;  %s2029_s16 = int_to_ptr.vmem [resolvable:$false] %s2028_s16 }
  0x58   : > { %v263_v36 = vmul.f32 %v237_v13, %v237_v13  ;;  %v277_v37 = vadd.f32 %v269_v32, %v261_v30  ;;  %v271_v38 = vmul.f32 %v245_v14, %v245_v14  ;;  %v264_v39 = vmul.f32 %v238_v17, %v238_v17  ;;  %p2026_p12 = pnand %p2025_p13, %p3005_p1  ;;  %s2030_s7 = scalar_lea.vmem %s2029_s16, 256 }
  0x59   : > { %v278_v40 = vadd.f32 %v270_v35, %v262_v33  ;;  %v272_v41 = vmul.f32 %v246_v18, %v246_v18  ;;  %v265_v42 = vmul.f32 %v239_v19, %v239_v19  ;;  %v273_v44 = vmul.f32 %v247_v20, %v247_v20  ;;  %p2031_p10 = scmp.lt.s32.totalorder %s2865_s5, %s2029_s16  ;;  %p2032_p0 = scmp.lt.s32.totalorder %s2030_s7, %s2024_s30 }
  0x5a   : > { %1857 = vmatmul.mubr.msk.f32.gmra.mxu0 %vm283_vm0, %v236_v11  ;;  %1881 = vmatmul.mubr.msk.f32.gmra.mxu1 %vm283_vm0, %v254_v15  ;;  %v279_v43 = vadd.f32 %v271_v38, %v263_v36  ;;  %v266_v45 = vmul.f32 %v240_v25, %v240_v25  ;;  %v274_v47 = vmul.f32 %v248_v26, %v248_v26  ;;  %p2027_p7 = pneg %p2026_p12 }
  0x5b   : > { %1859 = vmatprep.mubr.msk.f32.mxu0 %vm283_vm0, %v237_v13  ;;  %1883 = vmatprep.mubr.msk.f32.mxu1 %vm283_vm0, %v255_v16  ;;  %v280_v46 = vadd.f32 %v272_v41, %v264_v39  ;;  %v281_v48 = vadd.f32 %v273_v44, %v265_v42  ;;  %p2033_p2 = por %p2032_p0, %p2031_p10 }
  0x5c   : > { %v282_v49 = vadd.f32 %v274_v47, %v266_v45 }
  0x5d   : > { %p2034_p4 = pnand %p2033_p2, %p2027_p7 }
  0x5e   : > { %1860 = vmatmul.mubr.msk.f32.gmra.mxu0 %vm283_vm0, %v238_v17  ;;  %1884 = vmatmul.mubr.msk.f32.gmra.mxu1 %vm283_vm0, %v256_v21 }
  0x5f   : > { %1862 = vmatprep.mubr.msk.f32.mxu0 %vm283_vm0, %v239_v19  ;;  %1886 = vmatprep.mubr.msk.f32.mxu1 %vm283_vm0, %v257_v24 }
  0x62   : > { %1863 = vmatmul.mubr.msk.f32.gmra.mxu0 %vm283_vm0, %v240_v25  ;;  %1887 = vmatmul.mubr.msk.f32.gmra.mxu1 %vm283_vm0, %v258_v28 }
  0x63   : > { %1865 = vmatprep.mubr.msk.f32.mxu0 %vm283_vm0, %v241_v3  ;;  %1889 = vmatprep.mubr.msk.f32.mxu1 %vm283_vm0, %v275_v31 }
  0x66   : > { %1866 = vmatmul.mubr.msk.f32.gmra.mxu0 %vm283_vm0, %v242_v5  ;;  %1890 = vmatmul.mubr.msk.f32.gmra.mxu1 %vm283_vm0, %v276_v34 }
  0x67   : > { %1868 = vmatprep.mubr.msk.f32.mxu0 %vm283_vm0, %v243_v9  ;;  %1892 = vmatprep.mubr.msk.f32.mxu1 %vm283_vm0, %v277_v37 }
  0x6a   : > { %1869 = vmatmul.mubr.msk.f32.gmra.mxu0 %vm283_vm0, %v244_v12  ;;  %1893 = vmatmul.mubr.msk.f32.gmra.mxu1 %vm283_vm0, %v278_v40 }
  0x6b   : > { %1871 = vmatprep.mubr.msk.f32.mxu0 %vm283_vm0, %v245_v14  ;;  %1895 = vmatprep.mubr.msk.f32.mxu1 %vm283_vm0, %v279_v43 }
  0x6e   : > { %1872 = vmatmul.mubr.msk.f32.gmra.mxu0 %vm283_vm0, %v246_v18  ;;  %1896 = vmatmul.mubr.msk.f32.gmra.mxu1 %vm283_vm0, %v280_v46 }
  0x6f   : > { %1874 = vmatprep.mubr.msk.f32.mxu0 %vm283_vm0, %v247_v20  ;;  %1898 = vmatprep.mubr.msk.f32.mxu1 %vm283_vm0, %v281_v48 }
  0x72   : > { %1875 = vmatmul.mubr.msk.f32.gmra.mxu0 %vm283_vm0, %v248_v26  ;;  %1899 = vmatmul.mubr.msk.f32.gmra.mxu1 %vm283_vm0, %v282_v49 }
 0x116   : > { %v1855_v50 = vpop.f32.mrf.mxu0  ;;  %v1879_v51 = vpop.f32.mrf.mxu1 }
 0x117   : > { %v2346_v55 = vmul.f32 0.10936069, %v1855_v50  ;;  %v2348_v56 = vmul.f32 0.21300554, %v1855_v50  ;;  %v2350_v57 = vmul.f32 0.26601171, %v1855_v50 }
 0x118   : > { %v446_v52 = vpop.f32.mrf.mxu0  ;;  %v526_v54 = vpop.f32.mrf.mxu1  ;;  %v2352_v62 = vmul.f32 0.036000773, %v1855_v50  ;;  %v2357_v1 = vmul.f32 0.007598758, %v1855_v50  ;;  %v2359_v2 = vmul.f32 0.0010283801, %v1855_v50 }
 0x119   : > { %v621_v53 = vmul.f32 0.007598758, %v446_v52  ;;  %v605_v59 = vmul.f32 0.0010283801, %v446_v52  ;;  %v701_v60 = vmul.f32 0.036000773, %v446_v52 }
 0x11a   : > { %v629_v61 = vmul.f32 0.007598758, %v526_v54  ;;  %v2354_v63 = vmul.f32 0.10936069, %v446_v52  ;;  %v847_v0 = vrot.slane %v2346_v55, 3  ;;  %v992_v4 = vrot.slane %v2348_v56, 4  ;;  %v1858_v32 = vpop.f32.mrf.mxu0 }
 0x11b   : > { %v653_v58 = vrot.slane %v621_v53, 1  ;;  %v1137_v5 = vrot.slane %v2350_v57, 5  ;;  %v2363_v6 = vmul.f32 0.10936069, %v1879_v51  ;;  %v926_v7 = vmul.f32 0.21300554, %v446_v52 }
 0x11c   : > { %v733_v8 = vrot.slane %v701_v60, 2  ;;  %v613_v9 = vmul.f32 0.0010283801, %v526_v54  ;;  %v661_v10 = vrot.slane %v629_v61, 1  ;;  %v709_v11 = vmul.f32 0.036000773, %v526_v54  ;;  %v456_v49 = vpop.f32.mrf.mxu0 }
 0x11d   : > { %v685_v3 = vadd.f32 %v653_v58, %v605_v59  ;;  %v1218_v12 = vrot.slane %v2348_v56, 6  ;;  %v1299_v13 = vrot.slane %v2346_v55, 7  ;;  %v846_v14 = vrot.slane %v2354_v63, 3 }
 0x11e   : > { %v797_v15 = vmul.f32 0.10936069, %v526_v54  ;;  %v943_v17 = vmul.f32 0.21300554, %v1879_v51  ;;  %v1088_v18 = vmul.f32 0.26601171, %v1879_v51  ;;  %v693_v26 = vadd.f32 %v661_v10, %v613_v9 }
 0x11f   : > { %v765_v19 = vadd.f32 %v733_v8, %v685_v3  ;;  %v871_v21 = vrot.slane %v2363_v6, 3  ;;  %v2371_v22 = vmul.f32 0.036000773, %v1879_v51  ;;  %v1071_v23 = vmul.f32 0.26601171, %v446_v52 }
 0x120   : > { %v1323_v24 = vrot.slane %v2363_v6, 7  ;;  %v991_v25 = vrot.slane %v926_v7, 4  ;;  %v741_v27 = vrot.slane %v709_v11, 2  ;;  %v848_v28 = vsel %vm845_vm1, %v846_v14, %v847_v0 }
 0x121   : > { %2925 = vst [vmem:[#allocation11_spill] sm:$0xff] %v2371_v22  ;;  %v870_v29 = vrot.slane %v797_v15, 3  ;;  %v942_v30 = vmul.f32 0.21300554, %v526_v54  ;;  %v1087_v31 = vmul.f32 0.26601171, %v526_v54  ;;  %v910_v36 = vadd.f32 %v848_v28, %v765_v19  ;;  %v2388_v54 = vpop.f32.mrf.mxu1 }
 0x122   : > { %v1016_v33 = vrot.slane %v943_v17, 4  ;;  %v2375_v34 = vmul.f32 0.007598758, %v1879_v51  ;;  %v2377_v35 = vmul.f32 0.0010283801, %v1879_v51  ;;  %v1161_v37 = vrot.slane %v1088_v18, 5 }
 0x123   : > { %v1136_v38 = vrot.slane %v1071_v23, 5  ;;  %v1217_v39 = vrot.slane %v926_v7, 6  ;;  %v1298_v40 = vrot.slane %v2354_v63, 7  ;;  %v1242_v41 = vrot.slane %v943_v17, 6  ;;  %v536_v10 = vpop.f32.mrf.mxu1 }
 0x124   : > { %2926 = vst [vmem:[#allocation12_spill] sm:$0xff] %v2375_v34  ;;  %2927 = vst [vmem:[#allocation13_spill] sm:$0xff] %v2377_v35  ;;  %v773_v42 = vadd.f32 %v741_v27, %v693_v26  ;;  %v2380_v43 = vmul.f32 0.10936069, %v1858_v32  ;;  %v2382_v44 = vmul.f32 0.21300554, %v1858_v32  ;;  %v993_v45 = vsel %vm990_vm2, %v991_v25, %v992_v4 }
 0x125   : > { %v872_v46 = vsel %vm845_vm1, %v870_v29, %v871_v21  ;;  %v1015_v47 = vrot.slane %v942_v30, 4  ;;  %v1160_v48 = vrot.slane %v1087_v31, 5  ;;  %v1055_v52 = vadd.f32 %v993_v45, %v910_v36 }
 0x126   : > { %v1241_v53 = vrot.slane %v942_v30, 6  ;;  %v1138_v55 = vsel %vm1135_vm3, %v1136_v38, %v1137_v5  ;;  %v1219_v56 = vsel %vm1216_vm4, %v1217_v39, %v1218_v12  ;;  %v1300_v57 = vsel %vm1297_vm5, %v1298_v40, %v1299_v13 }
 0x127   : > { %v1322_v58 = vrot.slane %v797_v15, 7  ;;  %v918_v59 = vadd.f32 %v872_v46, %v773_v42  ;;  %v850_v60 = vrot.slane %v2380_v43, 3  ;;  %v995_v61 = vrot.slane %v2382_v44, 4 }
 0x128   : > { %v622_v63 = vmul.f32 0.007598758, %v456_v49  ;;  %v1017_v0 = vsel %vm990_vm2, %v1015_v47, %v1016_v33  ;;  %v1162_v3 = vsel %vm1135_vm3, %v1160_v48, %v1161_v37  ;;  %v702_v4 = vmul.f32 0.036000773, %v456_v49 }
 0x129   : > { %v2397_v6 = vmul.f32 0.10936069, %v456_v49  ;;  %v1200_v7 = vadd.f32 %v1138_v55, %v1055_v52  ;;  %v1243_v5 = vsel %vm1216_vm4, %v1241_v53, %v1242_v41  ;;  %v606_v8 = vmul.f32 0.0010283801, %v456_v49 }
 0x12a   : > { %v654_v9 = vrot.slane %v622_v63, 1  ;;  %v2401_v11 = vsel %vm1297_vm5, %v1322_v58, %v1323_v24  ;;  %v1074_v12 = vmul.f32 0.26601171, %v1858_v32  ;;  %v1221_v13 = vrot.slane %v2382_v44, 6 }
 0x12b   : > { %v2404_v14 = vmul.f32 0.007598758, %v1858_v32  ;;  %v1063_v15 = vadd.f32 %v1017_v0, %v918_v59  ;;  %v2406_v17 = vmul.f32 0.036000773, %v1858_v32  ;;  %v734_v19 = vrot.slane %v702_v4, 2 }
 0x12c   : > { %v686_v18 = vadd.f32 %v654_v9, %v606_v8  ;;  %v1302_v21 = vrot.slane %v2380_v43, 7  ;;  %v849_v23 = vrot.slane %v2397_v6, 3  ;;  %v928_v25 = vmul.f32 0.21300554, %v456_v49 }
 0x12d   : > { %v630_v26 = vmul.f32 0.007598758, %v536_v10  ;;  %v1281_v27 = vadd.f32 %v1219_v56, %v1200_v7  ;;  %v2410_v28 = vmul.f32 0.0010283801, %v1858_v32  ;;  %v2413_v24 = vmul.f32 0.10936069, %v2388_v54 }
 0x12e   : > { %v766_v29 = vadd.f32 %v734_v19, %v686_v18  ;;  %v1140_v30 = vrot.slane %v1074_v12, 5  ;;  %v945_v33 = vmul.f32 0.21300554, %v2388_v54  ;;  %v1090_v36 = vmul.f32 0.26601171, %v2388_v54 }
 0x12f   : > { %v1208_v37 = vadd.f32 %v1162_v3, %v1063_v15  ;;  %v614_v38 = vmul.f32 0.0010283801, %v536_v10  ;;  %v662_v39 = vrot.slane %v630_v26, 1  ;;  %v710_v40 = vmul.f32 0.036000773, %v536_v10  ;;  %v1861_v3 = vpop.f32.mrf.mxu0 }
 0x130   : > { %v851_v41 = vsel %vm845_vm1, %v849_v23, %v850_v60  ;;  %v994_v42 = vrot.slane %v928_v25, 4  ;;  %v1073_v32 = vmul.f32 0.26601171, %v456_v49  ;;  %v799_v43 = vmul.f32 0.10936069, %v536_v10 }
 0x131   : > { %v1362_v45 = vadd.f32 %v1300_v57, %v1281_v27  ;;  %v874_v47 = vrot.slane %v2413_v24, 3  ;;  %v911_v48 = vadd.f32 %v851_v41, %v766_v29  ;;  %v1019_v52 = vrot.slane %v945_v33, 4  ;;  %v466_v26 = vpop.f32.mrf.mxu0 }
 0x132   : > { %v1245_v53 = vrot.slane %v945_v33, 6  ;;  %v1326_v55 = vrot.slane %v2413_v24, 7  ;;  %v944_v56 = vmul.f32 0.21300554, %v536_v10  ;;  %v1289_v58 = vadd.f32 %v1243_v5, %v1208_v37  ;;  %v2442_v33 = vpop.f32.mrf.mxu1 }
 0x133   : > { %v694_v59 = vadd.f32 %v662_v39, %v614_v38  ;;  %v742_v63 = vrot.slane %v710_v40, 2  ;;  %v1089_v0 = vmul.f32 0.26601171, %v536_v10  ;;  %v1164_v60 = vrot.slane %v1090_v36, 5 }
 0x134   : > { %v996_v49 = vsel %vm990_vm2, %v994_v42, %v995_v61  ;;  %v1139_v4 = vrot.slane %v1073_v32, 5  ;;  %v873_v57 = vrot.slane %v799_v43, 3  ;;  %v2424_v7 = vmul.f32 0.036000773, %v2388_v54 }
 0x135   : > { %v1056_v8 = vadd.f32 %v996_v49, %v911_v48  ;;  %v1220_v9 = vrot.slane %v928_v25, 6  ;;  %v1301_v12 = vrot.slane %v2397_v6, 7  ;;  %v2428_v15 = vmul.f32 0.007598758, %v2388_v54 }
 0x136   : > { %2928 = vst [vmem:[#allocation14_spill] sm:$0xff] %v2424_v7  ;;  %v1018_v5 = vrot.slane %v944_v56, 4  ;;  %v1244_v18 = vrot.slane %v944_v56, 6  ;;  %v2430_v19 = vmul.f32 0.10936069, %v1861_v3  ;;  %v774_v61 = vadd.f32 %v742_v63, %v694_v59 }
 0x137   : > { %2929 = vst [vmem:[#allocation15_spill] sm:$0xff] %v2428_v15  ;;  %v2433_v10 = vmul.f32 0.0010283801, %v2388_v54  ;;  %v1163_v23 = vrot.slane %v1089_v0, 5  ;;  %v2436_v27 = vadd.f32 %v2352_v62, %v1362_v45  ;;  %v1141_v25 = vsel %vm1135_vm3, %v1139_v4, %v1140_v30 }
 0x138   : > { %v875_v6 = vsel %vm845_vm1, %v873_v57, %v874_v47  ;;  %v1325_v24 = vrot.slane %v799_v43, 7  ;;  %v2440_v29 = vmul.f32 0.21300554, %v1861_v3  ;;  %v2445_v36 = vadd.f32 %v2401_v11, %v1289_v58 }
 0x139   : > { %2930 = vst [vmem:[#allocation16_spill] sm:$0xff] %v2433_v10  ;;  %v1201_v54 = vadd.f32 %v1141_v25, %v1056_v8  ;;  %v1222_v37 = vsel %vm1216_vm4, %v1220_v9, %v1221_v13  ;;  %v1303_v62 = vsel %vm1297_vm5, %v1301_v12, %v1302_v21  ;;  %v1020_v38 = vsel %vm990_vm2, %v1018_v5, %v1019_v52  ;;  %v546_v21 = vpop.f32.mrf.mxu1 }
 0x13a   : > { %2931 = vst [vmem:[#allocation17_spill] sm:$0xff] %v2445_v36  ;;  %v1246_v30 = vsel %vm1216_vm4, %v1244_v18, %v1245_v53  ;;  %v853_v39 = vrot.slane %v2430_v19, 3  ;;  %v623_v40 = vmul.f32 0.007598758, %v466_v26  ;;  %v919_v41 = vadd.f32 %v875_v6, %v774_v61 }
 0x13b   : > { %v1165_v42 = vsel %vm1135_vm3, %v1163_v23, %v1164_v60  ;;  %v703_v32 = vmul.f32 0.036000773, %v466_v26  ;;  %v2455_v11 = vmul.f32 0.10936069, %v466_v26  ;;  %v1327_v43 = vsel %vm1297_vm5, %v1325_v24, %v1326_v55 }
 0x13c   : > { %v998_v44 = vrot.slane %v2440_v29, 4  ;;  %v607_v13 = vmul.f32 0.0010283801, %v466_v26  ;;  %v655_v45 = vrot.slane %v623_v40, 1  ;;  %v1282_v47 = vadd.f32 %v1222_v37, %v1201_v54 }
 0x13d   : > { %v1076_v48 = vmul.f32 0.26601171, %v1861_v3  ;;  %v1224_v52 = vrot.slane %v2440_v29, 6  ;;  %v1305_v53 = vrot.slane %v2430_v19, 7  ;;  %v735_v58 = vrot.slane %v703_v32, 2 }
 0x13e   : > { %v687_v56 = vadd.f32 %v655_v45, %v607_v13  ;;  %v852_v59 = vrot.slane %v2455_v11, 3  ;;  %v930_v63 = vmul.f32 0.21300554, %v466_v26  ;;  %v1064_v0 = vadd.f32 %v1020_v38, %v919_v41 }
 0x13f   : > { %v2462_v60 = vmul.f32 0.036000773, %v1861_v3  ;;  %v2464_v55 = vmul.f32 0.007598758, %v1861_v3  ;;  %v631_v49 = vmul.f32 0.007598758, %v546_v21  ;;  %v1363_v24 = vadd.f32 %v1303_v62, %v1282_v47 }
 0x140   : > { %v2466_v4 = vmul.f32 0.0010283801, %v1861_v3  ;;  %v802_v57 = vmul.f32 0.10936069, %v2442_v33  ;;  %v947_v8 = vmul.f32 0.21300554, %v2442_v33  ;;  %v767_v9 = vadd.f32 %v735_v58, %v687_v56  ;;  %v1864_v56 = vpop.f32.mrf.mxu0 }
 0x141   : > { %v1143_v12 = vrot.slane %v1076_v48, 5  ;;  %v615_v5 = vmul.f32 0.0010283801, %v546_v21  ;;  %v663_v18 = vrot.slane %v631_v49, 1  ;;  %v711_v19 = vmul.f32 0.036000773, %v546_v21 }
 0x142   : > { %v854_v61 = vsel %vm845_vm1, %v852_v59, %v853_v39  ;;  %v997_v23 = vrot.slane %v930_v63, 4  ;;  %v1075_v25 = vmul.f32 0.26601171, %v466_v26  ;;  %v801_v6 = vmul.f32 0.10936069, %v546_v21 }
 0x143   : > { %v1209_v29 = vadd.f32 %v1165_v42, %v1064_v0  ;;  %v1092_v54 = vmul.f32 0.26601171, %v2442_v33  ;;  %v912_v3 = vadd.f32 %v854_v61, %v767_v9  ;;  %v877_v40 = vrot.slane %v802_v57, 3 }
 0x144   : > { %v1022_v41 = vrot.slane %v947_v8, 4  ;;  %v1248_v32 = vrot.slane %v947_v8, 6  ;;  %v695_v13 = vadd.f32 %v663_v18, %v615_v5  ;;  %v743_v45 = vrot.slane %v711_v19, 2 }
 0x145   : > { %v946_v48 = vmul.f32 0.21300554, %v546_v21  ;;  %v999_v39 = vsel %vm990_vm2, %v997_v23, %v998_v44  ;;  %v1142_v26 = vrot.slane %v1075_v25, 5  ;;  %v876_v58 = vrot.slane %v801_v6, 3 }
 0x146   : > { %v1091_v62 = vmul.f32 0.26601171, %v546_v21  ;;  %v1290_v42 = vadd.f32 %v1246_v30, %v1209_v29  ;;  %v1167_v47 = vrot.slane %v1092_v54, 5  ;;  %v1329_v59 = vrot.slane %v802_v57, 7  ;;  %v2491_v29 = vpop.f32.mrf.mxu1  ;;  %v476_v54 = vpop.f32.mrf.mxu0 }
 0x147   : > { %v1057_v0 = vadd.f32 %v999_v39, %v912_v3  ;;  %v2476_v49 = vmul.f32 0.036000773, %v2442_v33  ;;  %v1223_v9 = vrot.slane %v930_v63, 6  ;;  %v1304_v61 = vrot.slane %v2455_v11, 7 }
 0x148   : > { %v2479_v8 = vmul.f32 0.10936069, %v1864_v56  ;;  %v2482_v5 = vmul.f32 0.007598758, %v2442_v33  ;;  %v775_v18 = vadd.f32 %v743_v45, %v695_v13  ;;  %v1021_v44 = vrot.slane %v946_v48, 4  ;;  %v1867_v50 = vpop.f32.mrf.mxu0 }
 0x149   : > { %2932 = vst [vmem:[#allocation18_spill] sm:$0xff] %v2476_v49  ;;  %v1247_v19 = vrot.slane %v946_v48, 6  ;;  %v1144_v21 = vsel %vm1135_vm3, %v1142_v26, %v1143_v12  ;;  %v878_v30 = vsel %vm845_vm1, %v876_v58, %v877_v40  ;;  %v1166_v57 = vrot.slane %v1091_v62, 5 }
 0x14a   : > { %2933 = vst [vmem:[#allocation19_spill] sm:$0xff] %v2482_v5  ;;  %v1328_v23 = vrot.slane %v801_v6, 7  ;;  %v2486_v25 = vadd.f32 %v1327_v43, %v1290_v42  ;;  %v2489_v63 = vmul.f32 0.0010283801, %v2442_v33  ;;  %v1202_v11 = vadd.f32 %v1144_v21, %v1057_v0  ;;  %v556_v42 = vpop.f32.mrf.mxu1 }
 0x14b   : > { %v2494_v3 = vadd.f32 %v2406_v17, %v1363_v24  ;;  %v1225_v13 = vsel %vm1216_vm4, %v1223_v9, %v1224_v52  ;;  %v1306_v12 = vsel %vm1297_vm5, %v1304_v61, %v1305_v53  ;;  %v856_v40 = vrot.slane %v2479_v8, 3 }
 0x14c   : > { %2934 = vst [vmem:[#allocation20_spill] sm:$0xff] %v2486_v25  ;;  %2935 = vst [vmem:[#allocation21_spill] sm:$0xff] %v2489_v63  ;;  %v2499_v45 = vmul.f32 0.21300554, %v1864_v56  ;;  %v920_v43 = vadd.f32 %v878_v30, %v775_v18  ;;  %v1023_v6 = vsel %vm990_vm2, %v1021_v44, %v1022_v41  ;;  %v1249_v33 = vsel %vm1216_vm4, %v1247_v19, %v1248_v32 }
 0x14d   : > { %v2503_v48 = vmul.f32 0.26601171, %v1864_v56  ;;  %v1168_v39 = vsel %vm1135_vm3, %v1166_v57, %v1167_v47  ;;  %v2507_v17 = vsel %vm1297_vm5, %v1328_v23, %v1329_v59  ;;  %v624_v24 = vmul.f32 0.007598758, %v476_v54 }
 0x14e   : > { %v704_v52 = vmul.f32 0.036000773, %v476_v54  ;;  %v1283_v26 = vadd.f32 %v1225_v13, %v1202_v11  ;;  %v1308_v53 = vrot.slane %v2479_v8, 7  ;;  %v2510_v58 = vmul.f32 0.036000773, %v1864_v56 }
 0x14f   : > { %v787_v62 = vmul.f32 0.10936069, %v476_v54  ;;  %v1001_v41 = vrot.slane %v2499_v45, 4  ;;  %v608_v0 = vmul.f32 0.0010283801, %v476_v54  ;;  %v656_v9 = vrot.slane %v624_v24, 1 }
 0x150   : > { %v1065_v61 = vadd.f32 %v1023_v6, %v920_v43  ;;  %v1146_v47 = vrot.slane %v2503_v48, 5  ;;  %v2515_v59 = vmul.f32 0.007598758, %v1864_v56  ;;  %v2517_v18 = vmul.f32 0.0010283801, %v1864_v56 }
 0x151   : > { %v2520_v44 = vmul.f32 0.10936069, %v2491_v29  ;;  %v688_v19 = vadd.f32 %v656_v9, %v608_v0  ;;  %v736_v21 = vrot.slane %v704_v52, 2  ;;  %v632_v30 = vmul.f32 0.007598758, %v556_v42 }
 0x152   : > { %2936 = vst [vmem:[#allocation22_spill] sm:$0xff] %v2517_v18  ;;  %v1364_v57 = vadd.f32 %v1306_v12, %v1283_v26  ;;  %v949_v23 = vmul.f32 0.21300554, %v2491_v29  ;;  %v855_v11 = vrot.slane %v787_v62, 3  ;;  %v932_v13 = vmul.f32 0.21300554, %v476_v54 }
 0x153   : > { %v768_v51 = vadd.f32 %v736_v21, %v688_v19  ;;  %v616_v24 = vmul.f32 0.0010283801, %v556_v42  ;;  %v664_v43 = vrot.slane %v632_v30, 1  ;;  %v712_v6 = vmul.f32 0.036000773, %v556_v42 }
 0x154   : > { %v1210_v48 = vadd.f32 %v1168_v39, %v1065_v61  ;;  %v1094_v56 = vmul.f32 0.26601171, %v2491_v29  ;;  %v2525_v38 = vmul.f32 0.10936069, %v556_v42  ;;  %v880_v52 = vrot.slane %v2520_v44, 3 }
 0x155   : > { %v1077_v26 = vmul.f32 0.26601171, %v476_v54  ;;  %v1025_v9 = vrot.slane %v949_v23, 4  ;;  %v857_v19 = vsel %vm845_vm1, %v855_v11, %v856_v40  ;;  %v1000_v21 = vrot.slane %v932_v13, 4 }
 0x156   : > { %v948_v30 = vmul.f32 0.21300554, %v556_v42  ;;  %v913_v46 = vadd.f32 %v857_v19, %v768_v51  ;;  %v696_v39 = vadd.f32 %v664_v43, %v616_v24  ;;  %v744_v61 = vrot.slane %v712_v6, 2 }
 0x157   : > { %v1093_v20 = vmul.f32 0.26601171, %v556_v42  ;;  %v1291_v37 = vadd.f32 %v1249_v33, %v1210_v48  ;;  %v1170_v31 = vrot.slane %v1094_v56, 5  ;;  %v1251_v16 = vrot.slane %v949_v23, 6 }
 0x158   : > { %v879_v0 = vrot.slane %v2525_v38, 3  ;;  %v2533_v32 = vmul.f32 0.036000773, %v2491_v29  ;;  %v2536_v54 = vmul.f32 0.007598758, %v2491_v29  ;;  %v1145_v12 = vrot.slane %v1077_v26, 5 }
 0x159   : > { %v1307_v40 = vrot.slane %v787_v62, 7  ;;  %v1002_v11 = vsel %vm990_vm2, %v1000_v21, %v1001_v41  ;;  %v1226_v51 = vrot.slane %v932_v13, 6  ;;  %v1024_v24 = vrot.slane %v948_v30, 4 }
 0x15a   : > { %2937 = vst [vmem:[#allocation23_spill] sm:$0xff] %v2533_v32  ;;  %2938 = vst [vmem:[#allocation24_spill] sm:$0xff] %v2536_v54  ;;  %v2539_v43 = vmul.f32 0.10936069, %v1867_v50  ;;  %v2542_v33 = vmul.f32 0.0010283801, %v2491_v29  ;;  %v1058_v42 = vadd.f32 %v1002_v11, %v913_v46  ;;  %v776_v23 = vadd.f32 %v744_v61, %v696_v39 }
 0x15b   : > { %v1169_v6 = vrot.slane %v1093_v20, 5  ;;  %v881_v48 = vsel %vm845_vm1, %v879_v0, %v880_v52  ;;  %v1250_v56 = vrot.slane %v948_v30, 6  ;;  %v2546_v19 = vadd.f32 %v2507_v17, %v1291_v37  ;;  %v2561_v20 = vpop.f32.mrf.mxu1  ;;  %v486_v0 = vpop.f32.mrf.mxu0 }
 0x15c   : > { %2939 = vst [vmem:[#allocation25_spill] sm:$0xff] %v2542_v33  ;;  %v2549_v62 = vadd.f32 %v2462_v60, %v1364_v57  ;;  %v1147_v41 = vsel %vm1135_vm3, %v1145_v12, %v1146_v47  ;;  %v2555_v13 = vsel %vm1297_vm5, %v1307_v40, %v1308_v53  ;;  %v2557_v29 = vmul.f32 0.21300554, %v1867_v50 }
 0x15d   : > { %2940 = vst [vmem:[#allocation26_spill] sm:$0xff] %v2546_v19  ;;  %v2559_v46 = vmul.f32 0.26601171, %v1867_v50  ;;  %v2941_v37 = vrot.slane %v2499_v45, 6  ;;  %v1026_v60 = vsel %vm990_vm2, %v1024_v24, %v1025_v9  ;;  %v1331_v47 = vrot.slane %v2525_v38, 7  ;;  %v566_v40 = vpop.f32.mrf.mxu1 }
 0x15e   : > { %v859_v8 = vrot.slane %v2539_v43, 3  ;;  %v1203_v57 = vadd.f32 %v1147_v41, %v1058_v42  ;;  %v921_v53 = vadd.f32 %v881_v48, %v776_v23  ;;  %v1171_v52 = vsel %vm1135_vm3, %v1169_v6, %v1170_v31 }
 0x15f   : > { %v1228_v17 = vsel %vm1216_vm4, %v1226_v51, %v2941_v37  ;;  %v1252_v26 = vsel %vm1216_vm4, %v1250_v56, %v1251_v16  ;;  %v2572_v21 = vmul.f32 0.036000773, %v1867_v50  ;;  %v625_v30 = vmul.f32 0.007598758, %v486_v0 }
 0x160   : > { %v705_v45 = vmul.f32 0.036000773, %v486_v0  ;;  %v1004_v39 = vrot.slane %v2557_v29, 4  ;;  %v2577_v38 = vmul.f32 0.10936069, %v2561_v20  ;;  %v1284_v16 = vadd.f32 %v1228_v17, %v1203_v57 }
 0x161   : > { %v789_v61 = vmul.f32 0.10936069, %v486_v0  ;;  %v2580_v31 = vmul.f32 0.007598758, %v1867_v50  ;;  %v609_v51 = vmul.f32 0.0010283801, %v486_v0  ;;  %v1066_v42 = vadd.f32 %v1026_v60, %v921_v53 }
 0x162   : > { %v657_v24 = vrot.slane %v625_v30, 1  ;;  %v2582_v23 = vmul.f32 0.0010283801, %v1867_v50  ;;  %v2585_v6 = vmul.f32 0.21300554, %v2561_v20  ;;  %v737_v56 = vrot.slane %v705_v45, 2 }
 0x163   : > { %v617_v41 = vmul.f32 0.0010283801, %v566_v40  ;;  %v633_v37 = vmul.f32 0.007598758, %v566_v40  ;;  %v883_v9 = vrot.slane %v2577_v38, 3  ;;  %v858_v12 = vrot.slane %v789_v61, 3 }
 0x164   : > { %v689_v48 = vadd.f32 %v657_v24, %v609_v51  ;;  %v934_v35 = vmul.f32 0.21300554, %v486_v0  ;;  %v713_v11 = vmul.f32 0.036000773, %v566_v40  ;;  %v805_v63 = vmul.f32 0.10936069, %v566_v40 }
 0x165   : > { %v665_v34 = vrot.slane %v633_v37, 1  ;;  %v950_v30 = vmul.f32 0.21300554, %v566_v40  ;;  %v1096_v50 = vmul.f32 0.26601171, %v2561_v20  ;;  %v2942_v57 = vrot.slane %v2520_v44, 7 }
 0x166   : > { %v769_v33 = vadd.f32 %v737_v56, %v689_v48  ;;  %v745_v60 = vrot.slane %v713_v11, 2  ;;  %v1211_v45 = vadd.f32 %v1171_v52, %v1066_v42  ;;  %v1028_v51 = vrot.slane %v2585_v6, 4  ;;  %v1870_v11 = vpop.f32.mrf.mxu0 }
 0x167   : > { %v1333_v53 = vsel %vm1297_vm5, %v1331_v47, %v2942_v57  ;;  %v697_v24 = vadd.f32 %v665_v34, %v617_v41  ;;  %v882_v54 = vrot.slane %v805_v63, 3  ;;  %v860_v5 = vsel %vm845_vm1, %v858_v12, %v859_v8 }
 0x168   : > { %v1003_v48 = vrot.slane %v934_v35, 4  ;;  %v1079_v56 = vmul.f32 0.26601171, %v486_v0  ;;  %v1095_v37 = vmul.f32 0.26601171, %v566_v40  ;;  %v914_v10 = vadd.f32 %v860_v5, %v769_v33 }
 0x169   : > { %v777_v15 = vadd.f32 %v745_v60, %v697_v24  ;;  %v884_v17 = vsel %vm845_vm1, %v882_v54, %v883_v9  ;;  %v1027_v32 = vrot.slane %v950_v30, 4  ;;  %v1173_v49 = vrot.slane %v1096_v50, 5 }
 0x16a   : > { %v1254_v47 = vrot.slane %v2585_v6, 6  ;;  %v1335_v52 = vrot.slane %v2577_v38, 7  ;;  %v2600_v34 = vmul.f32 0.007598758, %v2561_v20  ;;  %v1310_v8 = vrot.slane %v789_v61, 7 }
 0x16b   : > { %v922_v12 = vadd.f32 %v884_v17, %v777_v15  ;;  %v1292_v0 = vadd.f32 %v1252_v26, %v1211_v45  ;;  %v1005_v5 = vsel %vm990_vm2, %v1003_v48, %v1004_v39  ;;  %v1148_v33 = vrot.slane %v1079_v56, 5  ;;  %v496_v17 = vpop.f32.mrf.mxu0 }
 0x16c   : > { %v1229_v40 = vrot.slane %v934_v35, 6  ;;  %v2603_v54 = vmul.f32 0.10936069, %v1870_v11  ;;  %v1059_v9 = vadd.f32 %v1005_v5, %v914_v10  ;;  %v1029_v42 = vsel %vm990_vm2, %v1027_v32, %v1028_v51 }
 0x16d   : > { %v1172_v41 = vrot.slane %v1095_v37, 5  ;;  %v1253_v50 = vrot.slane %v950_v30, 6  ;;  %v2607_v6 = vmul.f32 0.036000773, %v2561_v20  ;;  %v2610_v38 = vmul.f32 0.0010283801, %v2561_v20  ;;  %v1873_v19 = vpop.f32.mrf.mxu0 }
 0x16e   : > { %v1067_v61 = vadd.f32 %v1029_v42, %v922_v12  ;;  %v2612_v15 = vmul.f32 0.21300554, %v1870_v11  ;;  %v2944_v35 = vrot.slane %v2539_v43, 7  ;;  %v1334_v10 = vrot.slane %v805_v63, 7 }
 0x16f   : > { %2943 = vst [vmem:[#allocation27_spill] sm:$0xff] %v2610_v38  ;;  %v1365_v32 = vadd.f32 %v2555_v13, %v1284_v16  ;;  %v2945_v30 = vrot.slane %v2559_v46, 5  ;;  %v2946_v20 = vrot.slane %v2557_v29, 6  ;;  %v862_v45 = vrot.slane %v2603_v54, 3  ;;  %v2632_v16 = vpop.f32.mrf.mxu1 }
 0x170   : > { %v1312_v39 = vsel %vm1297_vm5, %v1310_v8, %v2944_v35  ;;  %v2626_v51 = vadd.f32 %v1333_v53, %v1292_v0  ;;  %v1174_v43 = vsel %vm1135_vm3, %v1172_v41, %v1173_v49  ;;  %v1255_v63 = vsel %vm1216_vm4, %v1253_v50, %v1254_v47 }
 0x171   : > { %v1150_v60 = vsel %vm1135_vm3, %v1148_v33, %v2945_v30  ;;  %v1231_v57 = vsel %vm1216_vm4, %v1229_v40, %v2946_v20  ;;  %v1082_v48 = vmul.f32 0.26601171, %v1870_v11  ;;  %v1212_v56 = vadd.f32 %v1174_v43, %v1067_v61  ;;  %v576_v35 = vpop.f32.mrf.mxu1 }
 0x172   : > { %2947 = vst [vmem:[#allocation28_spill] sm:$0xff] %v2626_v51  ;;  %v1204_v24 = vadd.f32 %v1150_v60, %v1059_v9  ;;  %v1007_v13 = vrot.slane %v2612_v15, 4  ;;  %v626_v29 = vmul.f32 0.007598758, %v496_v17  ;;  %v1336_v37 = vsel %vm1297_vm5, %v1334_v10, %v1335_v52 }
 0x173   : > { %v2635_v8 = vmul.f32 0.007598758, %v1870_v11  ;;  %v706_v53 = vmul.f32 0.036000773, %v496_v17  ;;  %v2637_v12 = vmul.f32 0.10936069, %v496_v17  ;;  %v1293_v41 = vadd.f32 %v1255_v63, %v1212_v56 }
 0x174   : > { %v610_v0 = vmul.f32 0.0010283801, %v496_v17  ;;  %v658_v47 = vrot.slane %v626_v29, 1  ;;  %v936_v5 = vmul.f32 0.21300554, %v496_v17  ;;  %v1285_v33 = vadd.f32 %v1231_v57, %v1204_v24 }
 0x175   : > { %v2640_v40 = vmul.f32 0.036000773, %v1870_v11  ;;  %v2642_v9 = vmul.f32 0.0010283801, %v1870_v11  ;;  %v861_v42 = vrot.slane %v2637_v12, 3  ;;  %v738_v61 = vrot.slane %v706_v53, 2 }
 0x176   : > { %v808_v52 = vmul.f32 0.10936069, %v2632_v16  ;;  %v690_v50 = vadd.f32 %v658_v47, %v610_v0  ;;  %v1152_v10 = vrot.slane %v1082_v48, 5  ;;  %v2648_v60 = vmul.f32 0.21300554, %v2632_v16 }
 0x177   : > { %v1081_v20 = vmul.f32 0.26601171, %v496_v17  ;;  %v1006_v24 = vrot.slane %v936_v5, 4  ;;  %v618_v43 = vmul.f32 0.0010283801, %v576_v35  ;;  %v2651_v11 = vadd.f32 %v2510_v58, %v1365_v32 }
 0x178   : > { %v770_v57 = vadd.f32 %v738_v61, %v690_v50  ;;  %v863_v63 = vsel %vm845_vm1, %v861_v42, %v862_v45  ;;  %v634_v56 = vmul.f32 0.007598758, %v576_v35  ;;  %v714_v29 = vmul.f32 0.036000773, %v576_v35 }
 0x179   : > { %v807_v0 = vmul.f32 0.10936069, %v576_v35  ;;  %v1374_v53 = vadd.f32 %v1336_v37, %v1293_v41  ;;  %v886_v47 = vrot.slane %v808_v52, 3  ;;  %v1098_v48 = vmul.f32 0.26601171, %v2632_v16 }
 0x17a   : > { %v915_v44 = vadd.f32 %v863_v63, %v770_v57  ;;  %v1151_v30 = vrot.slane %v1081_v20, 5  ;;  %v666_v46 = vrot.slane %v634_v56, 1  ;;  %v746_v49 = vrot.slane %v714_v29, 2 }
 0x17b   : > { %v885_v17 = vrot.slane %v807_v0, 3  ;;  %v1366_v50 = vadd.f32 %v1312_v39, %v1285_v33  ;;  %v1008_v61 = vsel %vm990_vm2, %v1006_v24, %v1007_v13  ;;  %v952_v26 = vmul.f32 0.21300554, %v576_v35 }
 0x17c   : > { %v1097_v58 = vmul.f32 0.26601171, %v576_v35  ;;  %v1031_v32 = vrot.slane %v2648_v60, 4  ;;  %v1338_v45 = vrot.slane %v808_v52, 7  ;;  %v1060_v42 = vadd.f32 %v1008_v61, %v915_v44 }
 0x17d   : > { %v698_v51 = vadd.f32 %v666_v46, %v618_v43  ;;  %v1406_v37 = vadd.f32 %v2607_v6, %v1374_v53  ;;  %v1176_v41 = vrot.slane %v1098_v48, 5  ;;  %v2659_v57 = vmul.f32 0.007598758, %v2632_v16  ;;  %v506_v48 = vpop.f32.mrf.mxu0 }
 0x17e   : > { %v1313_v20 = vrot.slane %v2637_v12, 7  ;;  %v1153_v39 = vsel %vm1135_vm3, %v1151_v30, %v1152_v10  ;;  %v1232_v33 = vrot.slane %v936_v5, 6  ;;  %v887_v35 = vsel %vm845_vm1, %v885_v17, %v886_v47 }
 0x17f   : > { %2948 = vst [vmem:[#allocation29_spill] sm:$0xff] %v2659_v57  ;;  %v778_v13 = vadd.f32 %v746_v49, %v698_v51  ;;  %v1030_v24 = vrot.slane %v952_v26, 4  ;;  %v1175_v63 = vrot.slane %v1097_v58, 5  ;;  %v1337_v52 = vrot.slane %v807_v0, 7 }
 0x180   : > { %v2664_v44 = vmul.f32 0.10936069, %v1873_v19  ;;  %v1257_v6 = vrot.slane %v2648_v60, 6  ;;  %v2669_v43 = vmul.f32 0.036000773, %v2632_v16  ;;  %v1205_v56 = vadd.f32 %v1153_v39, %v1060_v42 }
 0x181   : > { %v2673_v5 = vmul.f32 0.0010283801, %v2632_v16  ;;  %v923_v51 = vadd.f32 %v887_v35, %v778_v13  ;;  %v2676_v49 = vadd.f32 %v2572_v21, %v1366_v50  ;;  %v2950_v10 = vrot.slane %v2600_v34, 1  ;;  %v2692_v50 = vpop.f32.mrf.mxu1 }
 0x182   : > { %v2952_v29 = vrot.slane %v2612_v15, 6  ;;  %v2953_v0 = vrot.slane %v2603_v54, 7  ;;  %v1256_v47 = vrot.slane %v952_v26, 6  ;;  %v1032_v16 = vsel %vm990_vm2, %v1030_v24, %v1031_v32  ;;  %2954 = vst [vmem:[#allocation32_spill] sm:$0xff] %v2692_v50 }
 0x183   : > { %2949 = vst [vmem:[#allocation30_spill] sm:$0xff] %v2673_v5  ;;  %v2680_v30 = vadd.f32 %v2950_v10, %v1406_v37  ;;  %v1177_v17 = vsel %vm1135_vm3, %v1175_v63, %v1176_v41  ;;  %v1339_v21 = vsel %vm1297_vm5, %v1337_v52, %v1338_v45  ;;  %v865_v34 = vrot.slane %v2664_v44, 3  ;;  %v586_v63 = vpop.f32.mrf.mxu1 }
 0x184   : > { %v1234_v60 = vsel %vm1216_vm4, %v1232_v33, %v2952_v29  ;;  %v1315_v53 = vsel %vm1297_vm5, %v1313_v20, %v2953_v0  ;;  %v2694_v15 = vmul.f32 0.21300554, %v1873_v19  ;;  %v1084_v58 = vmul.f32 0.26601171, %v1873_v19 }
 0x185   : > { %2951 = vst [vmem:[#allocation31_spill] sm:$0xff] %v2680_v30  ;;  %v1286_v61 = vadd.f32 %v1234_v60, %v1205_v56  ;;  %v2696_v42 = vmul.f32 0.036000773, %v1873_v19  ;;  %v1068_v54 = vadd.f32 %v1032_v16, %v923_v51  ;;  %v2698_v37 = vmul.f32 0.007598758, %v1873_v19 }
 0x186   : > { %v2700_v26 = vmul.f32 0.0010283801, %v1873_v19  ;;  %v627_v32 = vmul.f32 0.007598758, %v506_v48  ;;  %v1258_v41 = vsel %vm1216_vm4, %v1256_v47, %v1257_v6  ;;  %v2704_v45 = vmul.f32 0.10936069, %v2692_v50 }
 0x187   : > { %v707_v20 = vmul.f32 0.036000773, %v506_v48  ;;  %v2706_v39 = vmul.f32 0.10936069, %v506_v48  ;;  %v611_v13 = vmul.f32 0.0010283801, %v506_v48  ;;  %v1367_v6 = vadd.f32 %v1315_v53, %v1286_v61 }
 0x188   : > { %v659_v35 = vrot.slane %v627_v32, 1  ;;  %v938_v24 = vmul.f32 0.21300554, %v506_v48  ;;  %v1010_v52 = vrot.slane %v2694_v15, 4  ;;  %v1155_v56 = vrot.slane %v1084_v58, 5 }
 0x189   : > { %v1236_v19 = vrot.slane %v2694_v15, 6  ;;  %v864_v51 = vrot.slane %v2706_v39, 3  ;;  %v1213_v10 = vadd.f32 %v1177_v17, %v1068_v54  ;;  %v739_v60 = vrot.slane %v707_v20, 2 }
 0x18a   : > { %v691_v29 = vadd.f32 %v659_v35, %v611_v13  ;;  %v619_v16 = vmul.f32 0.0010283801, %v586_v63  ;;  %v635_v12 = vmul.f32 0.007598758, %v586_v63  ;;  %v889_v32 = vrot.slane %v2704_v45, 3 }
 0x18b   : > { %v1009_v33 = vrot.slane %v938_v24, 4  ;;  %v1083_v30 = vmul.f32 0.26601171, %v506_v48  ;;  %v866_v58 = vsel %vm845_vm1, %v864_v51, %v865_v34  ;;  %v715_v7 = vmul.f32 0.036000773, %v586_v63 }
 0x18c   : > { %v771_v46 = vadd.f32 %v739_v60, %v691_v29  ;;  %v667_v15 = vrot.slane %v635_v12, 1  ;;  %v809_v25 = vmul.f32 0.10936069, %v586_v63  ;;  %v1294_v53 = vadd.f32 %v1258_v41, %v1213_v10  ;;  %v1876_v60 = vpop.f32.mrf.mxu0 }
 0x18d   : > { %v955_v17 = vmul.f32 0.21300554, %v2692_v50  ;;  %v1100_v61 = vmul.f32 0.26601171, %v2692_v50  ;;  %v747_v13 = vrot.slane %v715_v7, 2  ;;  %v1011_v48 = vsel %vm990_vm2, %v1009_v33, %v1010_v52 }
 0x18e   : > { %v916_v54 = vadd.f32 %v866_v58, %v771_v46  ;;  %v699_v20 = vadd.f32 %v667_v15, %v619_v16  ;;  %v888_v35 = vrot.slane %v809_v25, 3  ;;  %v954_v47 = vmul.f32 0.21300554, %v586_v63 }
 0x18f   : > { %v2719_v0 = vmul.f32 0.036000773, %v2692_v50  ;;  %v1154_v29 = vrot.slane %v1083_v30, 5  ;;  %v1099_v34 = vmul.f32 0.26601171, %v586_v63  ;;  %v1375_v46 = vadd.f32 %v1339_v21, %v1294_v53 }
 0x190   : > { %v2723_v12 = vmul.f32 0.007598758, %v2692_v50  ;;  %v1061_v41 = vadd.f32 %v1011_v48, %v916_v54  ;;  %v779_v51 = vadd.f32 %v747_v13, %v699_v20  ;;  %v890_v10 = vsel %vm845_vm1, %v888_v35, %v889_v32  ;;  %v2753_v48 = vpop.f32.mrf.mxu1 }
 0x191   : > { %v1034_v16 = vrot.slane %v955_v17, 4  ;;  %v1341_v7 = vrot.slane %v2704_v45, 7  ;;  %v1235_v58 = vrot.slane %v938_v24, 6  ;;  %v1179_v15 = vrot.slane %v1100_v61, 5 }
 0x192   : > { %2955 = vst [vmem:[#allocation33_spill] sm:$0xff] %v2723_v12  ;;  %v1316_v22 = vrot.slane %v2706_v39, 7  ;;  %v1033_v36 = vrot.slane %v954_v47, 4  ;;  %v1340_v33 = vrot.slane %v809_v25, 7  ;;  %v1156_v30 = vsel %vm1135_vm3, %v1154_v29, %v1155_v56 }
 0x193   : > { %v924_v63 = vadd.f32 %v890_v10, %v779_v51  ;;  %v1178_v52 = vrot.slane %v1099_v34, 5  ;;  %v2729_v5 = vmul.f32 0.10936069, %v1876_v60  ;;  %v1260_v54 = vrot.slane %v955_v17, 6 }
 0x194   : > { %v1206_v20 = vadd.f32 %v1156_v30, %v1061_v41  ;;  %v2733_v21 = vadd.f32 %v2640_v40, %v1367_v6  ;;  %v2736_v45 = vadd.f32 %v2669_v43, %v1375_v46  ;;  %v1237_v39 = vsel %vm1216_vm4, %v1235_v58, %v1236_v19  ;;  %v516_v40 = vpop.f32.mrf.mxu0 }
 0x195   : > { %v2739_v24 = vmul.f32 0.21300554, %v1876_v60  ;;  %v2741_v25 = vmul.f32 0.26601171, %v1876_v60  ;;  %v2957_v56 = vrot.slane %v2664_v44, 7  ;;  %v1035_v17 = vsel %vm990_vm2, %v1033_v36, %v1034_v16 }
 0x196   : > { %2956 = vst [vmem:[#allocation34_spill] sm:$0xff] %v2736_v45  ;;  %v1259_v61 = vrot.slane %v954_v47, 6  ;;  %v2748_v13 = vsel %vm1297_vm5, %v1340_v33, %v1341_v7  ;;  %v1069_v6 = vadd.f32 %v1035_v17, %v924_v63  ;;  %v1180_v43 = vsel %vm1135_vm3, %v1178_v52, %v1179_v15  ;;  %v596_v63 = vpop.f32.mrf.mxu1 }
 0x197   : > { %v1318_v53 = vsel %vm1297_vm5, %v1316_v22, %v2957_v56  ;;  %v868_v19 = vrot.slane %v2729_v5, 3  ;;  %v1287_v29 = vadd.f32 %v1237_v39, %v1206_v20  ;;  %v2755_v44 = vmul.f32 0.036000773, %v1876_v60 }
 0x198   : > { %v2757_v22 = vmul.f32 0.007598758, %v1876_v60  ;;  %v2759_v36 = vmul.f32 0.0010283801, %v1876_v60  ;;  %v1013_v47 = vrot.slane %v2739_v24, 4  ;;  %v1158_v34 = vrot.slane %v2741_v25, 5 }
 0x199   : > { %v2764_v41 = vmul.f32 0.10936069, %v2753_v48  ;;  %v628_v51 = vmul.f32 0.007598758, %v516_v40  ;;  %v1261_v10 = vsel %vm1216_vm4, %v1259_v61, %v1260_v54  ;;  %v708_v46 = vmul.f32 0.036000773, %v516_v40 }
 0x19a   : > { %2958 = vst [vmem:[#allocation35_spill] sm:$0xff] %v2759_v36  ;;  %v795_v16 = vmul.f32 0.10936069, %v516_v40  ;;  %v940_v7 = vmul.f32 0.21300554, %v516_v40  ;;  %v1214_v58 = vadd.f32 %v1180_v43, %v1069_v6  ;;  %v1368_v60 = vadd.f32 %v1318_v53, %v1287_v29 }
 0x19b   : > { %v612_v15 = vmul.f32 0.0010283801, %v516_v40  ;;  %v660_v33 = vrot.slane %v628_v51, 1  ;;  %v1085_v30 = vmul.f32 0.26601171, %v516_v40  ;;  %v1239_v52 = vrot.slane %v2739_v24, 6 }
 0x19c   : > { %v867_v39 = vrot.slane %v795_v16, 3  ;;  %v957_v25 = vmul.f32 0.21300554, %v2753_v48  ;;  %v1102_v56 = vmul.f32 0.26601171, %v2753_v48  ;;  %v740_v54 = vrot.slane %v708_v46, 2 }
 0x19d   : > { %v692_v17 = vadd.f32 %v660_v33, %v612_v15  ;;  %v1012_v32 = vrot.slane %v940_v7, 4  ;;  %v620_v6 = vmul.f32 0.0010283801, %v596_v63  ;;  %v636_v43 = vmul.f32 0.007598758, %v596_v63 }
 0x19e   : > { %v1295_v51 = vadd.f32 %v1261_v10, %v1214_v58  ;;  %v892_v40 = vrot.slane %v2764_v41, 3  ;;  %v1157_v29 = vrot.slane %v1085_v30, 5  ;;  %v869_v24 = vsel %vm845_vm1, %v867_v39, %v868_v19 }
 0x19f   : > { %v772_v53 = vadd.f32 %v740_v54, %v692_v17  ;;  %v668_v20 = vrot.slane %v636_v43, 1  ;;  %v716_v35 = vmul.f32 0.036000773, %v596_v63  ;;  %v811_v38 = vmul.f32 0.10936069, %v596_v63 }
 0x1a0   : > { %v1238_v50 = vrot.slane %v940_v7, 6  ;;  %v956_v57 = vmul.f32 0.21300554, %v596_v63  ;;  %v1101_v15 = vmul.f32 0.26601171, %v596_v63  ;;  %v1014_v46 = vsel %vm990_vm2, %v1012_v32, %v1013_v47 }
 0x1a1   : > { %v917_v12 = vadd.f32 %v869_v24, %v772_v53  ;;  %v700_v33 = vadd.f32 %v668_v20, %v620_v6  ;;  %v748_v61 = vrot.slane %v716_v35, 2  ;;  %v891_v36 = vrot.slane %v811_v38, 3 }
 0x1a2   : > { %v1037_v45 = vrot.slane %v957_v25, 4  ;;  %v1319_v58 = vrot.slane %v795_v16, 7  ;;  %v1036_v18 = vrot.slane %v956_v57, 4  ;;  %v1344_v30 = vrot.slane %v2764_v41, 7 }
 0x1a3   : > { %v1062_v10 = vadd.f32 %v1014_v46, %v917_v12  ;;  %v1159_v19 = vsel %vm1135_vm3, %v1157_v29, %v1158_v34  ;;  %v780_v39 = vadd.f32 %v748_v61, %v700_v33  ;;  %v893_v17 = vsel %vm845_vm1, %v891_v36, %v892_v40 }
 0x1a4   : > { %v1182_v54 = vrot.slane %v1102_v56, 5  ;;  %v1181_v43 = vrot.slane %v1101_v15, 5  ;;  %v1400_v63 = vadd.f32 %v2696_v42, %v1368_v60  ;;  %v1376_v32 = vadd.f32 %v2748_v13, %v1295_v51 }
 0x1a5   : > { %v1207_v7 = vadd.f32 %v1159_v19, %v1062_v10  ;;  %v1263_v35 = vrot.slane %v957_v25, 6  ;;  %v1240_v47 = vsel %vm1216_vm4, %v1238_v50, %v1239_v52  ;;  %v925_v12 = vadd.f32 %v893_v17, %v780_v39  ;;  %v2974_v19 = vld [vmem:[#allocation22_spill] sm:$0xff] }
 0x1a6   : > { %v2959_v20 = vrot.slane %v2729_v5, 7  ;;  %v1038_v34 = vsel %vm990_vm2, %v1036_v18, %v1037_v45  ;;  %v1262_v61 = vrot.slane %v956_v57, 6  ;;  %v1343_v56 = vrot.slane %v811_v38, 7  ;;  %v2976_v17 = vld [vmem:[#allocation34_spill] sm:$0xff] }
 0x1a7   : > { %v1288_v16 = vadd.f32 %v1240_v47, %v1207_v7  ;;  %v1070_v36 = vadd.f32 %v1038_v34, %v925_v12  ;;  %v2960_v6 = vrot.slane %v2357_v1, 1  ;;  %v2961_v13 = vrot.slane %v2580_v31, 1  ;;  %v2982_v47 = vld [vmem:[#allocation33_spill] sm:$0xff] }
 0x1a8   : > { %v1321_v41 = vsel %vm1297_vm5, %v1319_v58, %v2959_v20  ;;  %v1183_v52 = vsel %vm1135_vm3, %v1181_v43, %v1182_v54  ;;  %v2962_v5 = vrot.slane %v2635_v8, 1  ;;  %v2963_v18 = vrot.slane %v2698_v37, 1 }
 0x1a9   : > { %v1474_v42 = vadd.f32 %v2960_v6, %v2436_v27  ;;  %v1478_v60 = vadd.f32 %v2961_v13, %v2676_v49  ;;  %v1369_v50 = vadd.f32 %v1321_v41, %v1288_v16  ;;  %v1215_v45 = vadd.f32 %v1183_v52, %v1070_v36 }
 0x1aa   : > { %v1479_v25 = vadd.f32 %v2962_v5, %v2733_v21  ;;  %v1480_v57 = vadd.f32 %v2963_v18, %v1400_v63  ;;  %v2964_v38 = vrot.slane %v2404_v14, 1  ;;  %v2965_v27 = vrot.slane %v2464_v55, 1  ;;  %v2980_v63 = vld [vmem:[#allocation35_spill] sm:$0xff] }
 0x1ab   : > { %v2966_v49 = vrot.slane %v2515_v59, 1  ;;  %v1393_v40 = vmul.f32 0.036000773, %v2753_v48  ;;  %v1425_v8 = vmul.f32 0.007598758, %v2753_v48  ;;  %v1264_v37 = vsel %vm1216_vm4, %v1262_v61, %v1263_v35 }
 0x1ac   : > { %v1475_v1 = vadd.f32 %v2964_v38, %v2494_v3  ;;  %v1476_v31 = vadd.f32 %v2965_v27, %v2549_v62  ;;  %v1401_v21 = vadd.f32 %v2755_v44, %v1369_v50  ;;  %v1408_v53 = vadd.f32 %v2719_v0, %v1376_v32  ;;  %v2985_v50 = vld [vmem:[#allocation30_spill] sm:$0xff]  ;;  %v2987_v27 = vld [vmem:[#allocation11_spill] sm:$0xff] }
 0x1ad   : > { %v1477_v51 = vadd.f32 %v2966_v49, %v2651_v11  ;;  %v1296_v14 = vadd.f32 %v1264_v37, %v1215_v45  ;;  %v1345_v3 = vsel %vm1297_vm5, %v1343_v56, %v1344_v30  ;;  %v2967_v55 = vrot.slane %v2582_v23, 2  ;;  %v2988_v49 = vld [vmem:[#allocation20_spill] sm:$0xff]  ;;  %v2991_v37 = vld [vmem:[#allocation18_spill] sm:$0xff] }
 0x1ae   : > { %v2968_v29 = vrot.slane %v2757_v22, 1  ;;  %v2969_v11 = vrot.slane %v2359_v2, 2  ;;  %v2970_v15 = vrot.slane %v2642_v9, 2  ;;  %v2971_v33 = vrot.slane %v2700_v26, 2  ;;  %v2977_v2 = vld [vmem:[#allocation29_spill] sm:$0xff]  ;;  %v2979_v9 = vld [vmem:[#allocation32_spill] sm:$0xff] }
 0x1af   : > { %v1558_v62 = vadd.f32 %v2967_v55, %v1478_v60  ;;  %v1377_v0 = vadd.f32 %v1345_v3, %v1296_v14  ;;  %v2972_v10 = vrot.slane %v2410_v28, 2  ;;  %v2973_v23 = vrot.slane %v2466_v4, 2  ;;  %v2993_v3 = vld [vmem:[#allocation28_spill] sm:$0xff]  ;;  %v2994_v55 = vld [vmem:[#allocation23_spill] sm:$0xff] }
 0x1b0   : > { %v1481_v59 = vadd.f32 %v2968_v29, %v1401_v21  ;;  %v1554_v24 = vadd.f32 %v2969_v11, %v1474_v42  ;;  %v1559_v46 = vadd.f32 %v2970_v15, %v1479_v25  ;;  %v2822_v44 = vadd.f32 %v2971_v33, %v1480_v57  ;;  %v2995_v33 = vld [vmem:[#allocation15_spill] sm:$0xff] }
 0x1b1   : > { %v1555_v58 = vadd.f32 %v2972_v10, %v1475_v1  ;;  %v1556_v30 = vadd.f32 %v2973_v23, %v1476_v31  ;;  %v2975_v22 = vrot.slane %v2974_v19, 2  ;;  %v2978_v54 = vrot.slane %v2977_v2, 1  ;;  %v2986_v1 = vld [vmem:[#allocation17_spill] sm:$0xff]  ;;  %v2996_v10 = vld [vmem:[#allocation16_spill] sm:$0xff]  ;;  %v2997_v19 = vld [vmem:[#allocation19_spill] sm:$0xff] }
 0x1b2   : > { %v1504_v43 = vmul.f32 0.0010283801, %v2979_v9  ;;  %v1505_v26 = vmul.f32 0.0010283801, %v2753_v48  ;;  %v2981_v32 = vrot.slane %v2980_v63, 2  ;;  %v2983_v28 = vrot.slane %v2982_v47, 1 }
 0x1b3   : > { %v1557_v39 = vadd.f32 %v2975_v22, %v1477_v51  ;;  %v1487_v7 = vadd.f32 %v2978_v54, %v2976_v17  ;;  %v1457_v16 = vrot.slane %v1425_v8, 1  ;;  %v1409_v4 = vadd.f32 %v1393_v40, %v1377_v0  ;;  %v2984_v48 = vld [vmem:[#allocation27_spill] sm:$0xff]  ;;  %v2989_v51 = vld [vmem:[#allocation14_spill] sm:$0xff]  ;;  %v2998_v2 = vld [vmem:[#allocation24_spill] sm:$0xff] }
 0x1b4   : > { %v1561_v35 = vadd.f32 %v2981_v32, %v1481_v59  ;;  %v1488_v12 = vadd.f32 %v2983_v28, %v1408_v53  ;;  %v1578_v20 = vmul.f32 %v1558_v62, %v1558_v62  ;;  %v1574_v41 = vmul.f32 %v1554_v24, %v1554_v24  ;;  %v2990_v8 = vld [vmem:[#allocation26_spill] sm:$0xff]  ;;  %v2992_v53 = vld [vmem:[#allocation31_spill] sm:$0xff]  ;;  %v2999_v63 = vld [vmem:[#allocation21_spill] sm:$0xff] }
 0x1b5   : > { %v1579_v34 = vmul.f32 %v1559_v46, %v1559_v46  ;;  %v1580_v61 = vmul.f32 %v2822_v44, %v2822_v44  ;;  %v1489_v56 = vadd.f32 %v1457_v16, %v1409_v4  ;;  %v1575_v6 = vmul.f32 %v1555_v58, %v1555_v58  ;;  %v3000_v47 = vld [vmem:[#allocation12_spill] sm:$0xff] }
 0x1b6   : > { %v1581_v36 = vmul.f32 %v1561_v35, %v1561_v35  ;;  %v1576_v42 = vmul.f32 %v1556_v30, %v1556_v30  ;;  %v1577_v13 = vmul.f32 %v1557_v39, %v1557_v39  ;;  %v1534_v60 = vrot.slane %v2984_v48, 2 }
 0x1b7   : > { %v1535_v52 = vrot.slane %v2985_v50, 2  ;;  %v1536_v5 = vrot.slane %v1504_v43, 2  ;;  %v1582_v25 = vadd.f32 %v1578_v20, %v1574_v41  ;;  %v1537_v18 = vrot.slane %v1505_v26, 2  ;;  %v3002_v20 = vld [vmem:[#allocation25_spill] sm:$0xff] }
 0x1b8   : > { %v1583_v57 = vadd.f32 %v1579_v34, %v1575_v6  ;;  %v1584_v45 = vadd.f32 %v1580_v61, %v1576_v42  ;;  %v1585_v38 = vadd.f32 %v1581_v36, %v1577_v13  ;;  %v1402_v31 = vadd.f32 %v2987_v27, %v2986_v1 }
 0x1b9   : > { %v1403_v40 = vadd.f32 %v2989_v51, %v2988_v49  ;;  %v1404_v21 = vadd.f32 %v2991_v37, %v2990_v8  ;;  %v1566_v14 = vadd.f32 %v1534_v60, %v2992_v53  ;;  %v1405_v29 = vadd.f32 %v2994_v55, %v2993_v3 }
 0x1ba   : > { %v1567_v59 = vadd.f32 %v1535_v52, %v1487_v7  ;;  %v1568_v11 = vadd.f32 %v1536_v5, %v1488_v12  ;;  %v1569_v15 = vadd.f32 %v1537_v18, %v1489_v56  ;;  %v1451_v0 = vrot.slane %v2995_v33, 1  ;;  %v3003_v52 = vld [vmem:[#allocation13_spill] sm:$0xff] }
 0x1bb   : > { %v1531_v23 = vrot.slane %v2996_v10, 2  ;;  %v1452_v22 = vrot.slane %v2997_v19, 1  ;;  %v1590_v17 = vsub.f32 %v1566_v14, %v1582_v25  ;;  %v1453_v54 = vrot.slane %v2998_v2, 1 }
 0x1bc   : > { %v1591_v9 = vsub.f32 %v1567_v59, %v1583_v57  ;;  %v1592_v43 = vsub.f32 %v1568_v11, %v1584_v45  ;;  %v1593_v26 = vsub.f32 %v1569_v15, %v1585_v38  ;;  %v1532_v32 = vrot.slane %v2999_v63, 2 }
 0x1bd   : > { %v3001_v28 = vrot.slane %v3000_v47, 1  ;;  %v1483_v7 = vadd.f32 %v1451_v0, %v1403_v40  ;;  %v1484_v12 = vadd.f32 %v1452_v22, %v1404_v21  ;;  %v1485_v4 = vadd.f32 %v1453_v54, %v1405_v29 }
 0x1be   : > { %v1533_v41 = vrot.slane %v3002_v20, 2  ;;  %v1614_v34 = vadd.f32 6.5025, %v1582_v25  ;;  %v1615_v61 = vadd.f32 6.5025, %v1583_v57  ;;  %v1570_v36 = vmul.f32 %v1558_v62, %v1554_v24 }
 0x1bf   : > { %v1482_v16 = vadd.f32 %v3001_v28, %v1402_v31  ;;  %v1616_v56 = vadd.f32 6.5025, %v1584_v45  ;;  %v1617_v6 = vadd.f32 6.5025, %v1585_v38  ;;  %v1618_v42 = vadd.f32 58.5225, %v1590_v17 }
 0x1c0   : > { %v1571_v13 = vmul.f32 %v1559_v46, %v1555_v58  ;;  %v1619_v48 = vadd.f32 58.5225, %v1591_v9  ;;  %v1620_v60 = vadd.f32 58.5225, %v1592_v43  ;;  %v1621_v50 = vadd.f32 58.5225, %v1593_v26 }
 0x1c1   : > { %v3004_v5 = vrot.slane %v3003_v52, 2  ;;  %v1563_v1 = vadd.f32 %v1531_v23, %v1483_v7  ;;  %v1572_v27 = vmul.f32 %v2822_v44, %v1556_v30  ;;  %v1622_v31 = vmul.f32 %v1618_v42, %v1614_v34 }
 0x1c2   : > { %v1573_v49 = vmul.f32 %v1561_v35, %v1557_v39  ;;  %v1623_v51 = vmul.f32 %v1619_v48, %v1615_v61  ;;  %v1624_v40 = vmul.f32 %v1620_v60, %v1616_v56  ;;  %v1625_v25 = vmul.f32 %v1621_v50, %v1617_v6 }
 0x1c3   : > { %v1562_v18 = vadd.f32 %v3004_v5, %v1482_v16  ;;  %v1564_v57 = vadd.f32 %v1532_v32, %v1484_v12  ;;  %1960 = vrcp.f32 %v1622_v31  ;;  %v1565_v24 = vadd.f32 %v1533_v41, %v1485_v4 }
 0x1c4   : > { %v1587_v45 = vsub.f32 %v1563_v1, %v1571_v13  ;;  %1962 = vrcp.f32 %v1623_v51  ;;  %v1594_v37 = vmul.f32 2.0, %v1570_v36  ;;  %v1595_v44 = vmul.f32 2.0, %v1571_v13 }
 0x1c5   : > { %v1586_v62 = vsub.f32 %v1562_v18, %v1570_v36  ;;  %v1588_v46 = vsub.f32 %v1564_v57, %v1572_v27  ;;  %1964 = vrcp.f32 %v1624_v40  ;;  %v1589_v58 = vsub.f32 %v1565_v24, %v1573_v49 }
 0x1c6   : > { %1966 = vrcp.f32 %v1625_v25  ;;  %v1603_v8 = vmul.f32 2.0, %v1587_v45  ;;  %v1596_v39 = vmul.f32 2.0, %v1572_v27  ;;  %v1597_v53 = vmul.f32 2.0, %v1573_v49 }
 0x1c7   : > { %v1602_v38 = vmul.f32 2.0, %v1586_v62  ;;  %v1604_v21 = vmul.f32 2.0, %v1588_v46  ;;  %v1605_v30 = vmul.f32 2.0, %v1589_v58  ;;  %v1598_v3 = vadd.f32 6.5025, %v1594_v37 }
 0x1c8   : > { %v1607_v14 = vadd.f32 58.5225, %v1603_v8  ;;  %v1599_v29 = vadd.f32 6.5025, %v1595_v44  ;;  %v1600_v11 = vadd.f32 6.5025, %v1596_v39 }
 0x1c9   : > { %v1606_v35 = vadd.f32 58.5225, %v1602_v38  ;;  %v1608_v55 = vadd.f32 58.5225, %v1604_v21  ;;  %v1609_v59 = vadd.f32 58.5225, %v1605_v30 }
 0x1ca   : > { %v1601_v0 = vadd.f32 6.5025, %v1597_v53  ;;  %v1611_v10 = vmul.f32 %v1607_v14, %v1599_v29 }
 0x1cb   : > { %v1610_v15 = vmul.f32 %v1606_v35, %v1598_v3  ;;  %v1612_v19 = vmul.f32 %v1608_v55, %v1600_v11 }
 0x1cc   : > { %v1613_v2 = vmul.f32 %v1609_v59, %v1601_v0 }
 0x1d0   : > { %v1961_v33 = vpop.eup %1960 }
 0x1d1   : > { %v1963_v23 = vpop.eup %1962  ;;  %v1627_v22 = vmul.f32 %v1961_v33, %v1610_v15 }
 0x1d2   : > { %v1965_v17 = vpop.eup %1964  ;;  %v1629_v54 = vmul.f32 %v1963_v23, %v1611_v10 }
 0x1d3   : > { %v1967_v9 = vpop.eup %1966  ;;  %v1631_v43 = vmul.f32 %v1965_v17, %v1612_v19  ;;  %v1635_v63 = vsel %vm1634_vm6, %v1627_v22, 0.0 }
 0x1d4   : > { %v1633_v26 = vmul.f32 %v1967_v9, %v1613_v2  ;;  %v1636_v32 = vsel %vm1634_vm6, %v1629_v54, 0.0 }
 0x1d5   : > { %v1637_v47 = vadd.f32 %v1636_v32, %v1635_v63  ;;  %v1638_v28 = vsel %vm1634_vm6, %v1631_v43, 0.0 }
 0x1d6   : > { %v1640_v16 = vsel %vm1634_vm6, %v1633_v26, 0.0 }
 0x1d7   : > { %v1639_v7 = vadd.f32 %v1638_v28, %v1637_v47 }
 0x1d9   : > { %v1641_v12 = vadd.f32 %v1640_v16, %v1639_v7 }
 0x1db   : > { %1642 = vadd.xlane.f32.xlu0 %v1641_v12 }
 0x264   : > { %v1643_v4 = vpop.xlane.xlu0 %1642 }
 0x265   : > { %v1644_v20 = vrot.slane %v1643_v4, 4 }
 0x267   : > { %v1645_v41 = vadd.f32 %v1644_v20, %v1643_v4 }
 0x269   : > { %v1646_v34 = vrot.slane %v1645_v41, 2 }
 0x26b   : > { %v1647_v61 = vadd.f32 %v1646_v34, %v1645_v41 }
 0x26d   : > { %v1648_v36 = vrot.slane %v1647_v61, 1 }
 0x26f   : > { %v1649_v56 = vadd.f32 %v1648_v36, %v1647_v61 }
 0x271   : > { %1905 = vpush %v1649_v56 }
 0x2a2   : > { %s1906_s26 = spop %1905 }
 0x2a3   : > { %v1651_v6 = vstv %s1906_s26 }
 0x2a4   : > { %1652 = vst [vmem:[%s230_s4] sm:$0xff] %v1651_v6 }
 0x2a5   : > { %2037 = shalt.err (!%p2034_p4)
}
 0x2a6   : > { %s2038_s9 = scalar_lea.hbm %s1665_s22, 128  ;;  %s2042_s11 = scalar_lea.hbm %s2908_s3, 256 }
 0x2a7   : > { %p2039_p9 = scmp.ne.s32.totalorder %s1665_s22, %s2038_s9  ;;  %p2043_p5 = scmp.lt.s32.totalorder %s1665_s22, %s2908_s3 }
 0x2a8   : > { %p2044_p8 = scmp.lt.s32.totalorder %s2042_s11, %s2038_s9 }
 0x2a9   : > { %p2040_p11 = pnand %p2039_p9, %p3005_p1 }
 0x2aa   : > { %p2045_p6 = por %p2044_p8, %p2043_p5 }
 0x2ab   : > { %p2041_p3 = pneg %p2040_p11 }
 0x2ad   : > { %p2046_p13 = pnand %p2045_p6, %p2041_p3 }
 0x2af   : > { %2049 = shalt.err (!%p2046_p13)
}
 0x2b0   : > { %1911 = dma.vmem_to_hbm [thread:$0]  (%p3005_p1), %s2865_s5, 128, %s1665_s22, %s1654_s8  }
 0x2b1 PF: > { %s1679_s23 = sand.u32 1, %s2080_s12   ;;  %p3006_p12 = scmp.ne.s32.totalorder %s2921_s25, 0 }
 0x2b2   : > { %p3007_p7 = scmp.ge.s32.totalorder %s2092_s15, 2  ;;  %s1680_s4 = scalar_lea.sflag [#allocation4], %s1679_s23 }
 0x2b4   : > { %p1921_p10 = pnand %p3007_p7, %p3006_p12 }
 0x2b6   : > { %p1922_p0 = pneg %p1921_p10 }
 0x2b8   : > { %2075 = dma.done.wait (%p1922_p0), %s1680_s4, 128  }
 0x2b9   : > { %2077 = vsyncadd (%p1922_p0), %s1680_s4, 4294967168  ;;  %p19_p2 = scmp.ge.s32.totalorder %s2144_s18, 4   ;;  %s3008_s12 = smov %s2084_s13 }
 0x2ba   : > { %s3009_s13 = smov %s2088_s14  ;;  %s3010_s14 = smov %s2156_s21 }
 0x2bb   : > { %s3011_s15 = smov %s2144_s18  ;;  %21 = sbr.rel (!%p19_p2) target bundleno = 7 (0x7), region = 90 }
 0x2c0   :  { %1685 = vsyncpa [#allocation3], 1 }
 0x2c1   :  { %1687 = vsyncpa [#allocation3 + $0x1], 1 }
 0x2c2   :  { %1688 = vsyncpa [#allocation6], 1 }
 0x2c3   :  { %1690 = vsyncpa [#allocation6 + $0x1], 1 }
 0x2c4   :  { %1691 = vsyncpa [#allocation4], 1 }
 0x2c5   :  { %1693 = vsyncpa [#allocation4 + $0x1], 1 }

</bundles_post_ra>
